<compile_context>
chip_gen: v7x
topology: tpu7x:2x2x1
jax: 0.10.0
libtpu: 0.0.40
codegen_flags: <defaults>
</compile_context>

<pallas_src>
import functools
import math

import jax
import jax.numpy as jnp
from jax import lax
from jax.experimental import pallas as pl
from jax.experimental.pallas import tpu as pltpu


def _round_up(x, m):
    return ((x + m - 1) // m) * m


def _lstm_layer_kernel(x_ref, wih_ref, whh_ref, b_ref, out_ref,
                       xproj_sc, h_sc, c_sc,
                       *, seq_len: int, batch: int, apply_sigmoid: bool):
    """One LSTM layer over the full sequence (time-major, flattened 2-D).

    x_ref    : (T*Bp, Din)   bf16 time-major input, batch padded to Bp
    wih_ref  : (Din, 4*Hp)   bf16 pre-transposed, per-gate lane-padded W_ih
    whh_ref  : (Hp, 4*Hp)    bf16 pre-transposed, per-gate lane-padded W_hh
    b_ref    : (1, 4*Hp)     f32 combined bias (b_ih + b_hh), lane-padded
    out_ref  : (T*Bp, Hp)    f32 per-timestep hidden output (sigmoid if last)
    xproj_sc : (T*Bp, 4*Hp)  f32 scratch: hoisted input projection
    h_sc, c_sc : (Bp, Hp)    f32 scratch: running LSTM state
    """
    Hp = h_sc.shape[1]

    # ---- Phase 1: hoisted input projection, one tall matmul + one broadcast.
    xproj_sc[...] = (
        jnp.dot(x_ref[...], wih_ref[...], preferred_element_type=jnp.float32)
        + b_ref[...]
    )

    # ---- Phase 2: serial recurrence; only h @ W_hh^T on the critical chain.
    h_sc[...] = jnp.zeros_like(h_sc)
    c_sc[...] = jnp.zeros_like(c_sc)

    def step(t, carry):
        row = pl.multiple_of(t * batch, batch)          # sublane-aligned start
        gates = xproj_sc[pl.ds(row, batch), :] + jnp.dot(
            h_sc[...].astype(jnp.bfloat16), whh_ref[...],
            preferred_element_type=jnp.float32)          # (Bp, 4*Hp) f32

        # PyTorch gate order: i, f, g, o — each gate a 128-lane-aligned block.
        i = jax.nn.sigmoid(gates[:, 0 * Hp:1 * Hp])
        f = jax.nn.sigmoid(gates[:, 1 * Hp:2 * Hp])
        g = jnp.tanh(gates[:, 2 * Hp:3 * Hp])
        o = jax.nn.sigmoid(gates[:, 3 * Hp:4 * Hp])

        c_new = f * c_sc[...] + i * g                    # f32 state math
        h_new = o * jnp.tanh(c_new)
        c_sc[...] = c_new
        h_sc[...] = h_new

        if apply_sigmoid:
            out_ref[pl.ds(row, batch), :] = jax.nn.sigmoid(h_new)
        else:
            out_ref[pl.ds(row, batch), :] = h_new
        return carry

    lax.fori_loop(0, seq_len, step, 0, unroll=True)


def _pad_gate_cols(m, H, Hp):
    """(rows, 4H) -> (rows, 4*Hp): each gate block zero-padded to Hp lanes."""
    gates = [jnp.pad(m[:, k * H:(k + 1) * H], ((0, 0), (0, Hp - H)))
             for k in range(4)]
    return jnp.concatenate(gates, axis=1)


def _run_lstm_layer(x2d, w_ih, w_hh, b_ih, b_hh, *, T, Bp, Hp, apply_sigmoid):
    """x2d: (T*Bp, Din) bf16. Weights in PyTorch layout (4H, Din)/(4H, H)."""
    TB, Din = x2d.shape
    H = w_ih.shape[0] // 4

    # Transpose + per-gate lane padding (+ zero pad extra input rows).
    wih_t = _pad_gate_cols(jnp.asarray(w_ih, jnp.float32).T, H, Hp)   # (Din_w, 4Hp)
    if wih_t.shape[0] < Din:
        wih_t = jnp.pad(wih_t, ((0, Din - wih_t.shape[0]), (0, 0)))
    whh_t = _pad_gate_cols(jnp.asarray(w_hh, jnp.float32).T, H, Hp)   # (H, 4Hp)
    whh_t = jnp.pad(whh_t, ((0, Hp - H), (0, 0)))                     # (Hp, 4Hp)
    bias = _pad_gate_cols(
        (jnp.asarray(b_ih, jnp.float32)
         + jnp.asarray(b_hh, jnp.float32)).reshape(1, 4 * H), H, Hp)  # (1, 4Hp)

    kernel = functools.partial(_lstm_layer_kernel, seq_len=T, batch=Bp,
                               apply_sigmoid=apply_sigmoid)

    out = pl.pallas_call(
        kernel,
        out_shape=jax.ShapeDtypeStruct((TB, Hp), jnp.float32),
        in_specs=[
            pl.BlockSpec(memory_space=pltpu.MemorySpace.VMEM),  # x (bf16)
            pl.BlockSpec(memory_space=pltpu.MemorySpace.VMEM),  # W_ih^T (bf16)
            pl.BlockSpec(memory_space=pltpu.MemorySpace.VMEM),  # W_hh^T (bf16)
            pl.BlockSpec(memory_space=pltpu.MemorySpace.VMEM),  # bias (f32)
        ],
        out_specs=pl.BlockSpec(memory_space=pltpu.MemorySpace.VMEM),
        scratch_shapes=[
            pltpu.VMEM((TB, 4 * Hp), jnp.float32),   # hoisted input projection
            pltpu.VMEM((Bp, Hp), jnp.float32),       # h state
            pltpu.VMEM((Bp, Hp), jnp.float32),       # c state
        ],
    )(x2d, wih_t.astype(jnp.bfloat16), whh_t.astype(jnp.bfloat16), bias)
    return out


def decoder_rnn_forward(x_btd, params):
    """x_btd: (B, T, hidden_size) batch_first, like the PyTorch module."""
    B, T, Din = x_btd.shape
    H = params[0][1].shape[1]                 # output_size (W_hh is (4H, H))
    Bp = _round_up(max(B, 8), 8)              # pad batch to whole sublanes
    Hp = _round_up(max(H, 128), 128)          # pad each gate to whole lanes

    # Layout plumbing in the wrapper: time-major, batch-padded, flattened 2-D.
    xt = jnp.transpose(x_btd, (1, 0, 2))                       # (T, B, Din)
    xt = jnp.pad(xt, ((0, 0), (0, Bp - B), (0, 0)))            # (T, Bp, Din)
    cur = xt.reshape(T * Bp, Din).astype(jnp.bfloat16)

    num_layers = len(params)
    out2d = None
    for layer, (w_ih, w_hh, b_ih, b_hh) in enumerate(params):
        last = layer == num_layers - 1
        out2d = _run_lstm_layer(cur, w_ih, w_hh, b_ih, b_hh,
                                T=T, Bp=Bp, Hp=Hp, apply_sigmoid=last)
        cur = out2d.astype(jnp.bfloat16)      # next layer consumes padded h

    out = out2d.reshape(T, Bp, Hp)[:, :B, :H]                  # unpad
    return jnp.transpose(out, (1, 0, 2))                       # (B, T, H)


def _xavier_uniform(key, shape, gain):
    fan_out, fan_in = shape
    a = gain * math.sqrt(6.0 / (fan_in + fan_out))
    return jax.random.uniform(key, shape, jnp.float32, minval=-a, maxval=a)


def make_params(key, hidden_size, output_size, num_layers):
    """Deterministic parameter construction matching nn.LSTM shapes.

    weight_ih_l{k}: (4*output_size, in_k), weight_hh_l{k}: (4*output_size, output_size)
    bias_ih / bias_hh: (4*output_size,)
    xavier_uniform(gain=sqrt(2)) on the weights (as in the module's __init__);
    biases use the default-style uniform(-1/sqrt(H), 1/sqrt(H)).
    """
    params = []
    k = 1.0 / math.sqrt(output_size)
    for layer in range(num_layers):
        in_dim = hidden_size if layer == 0 else output_size
        key, k1, k2, k3, k4 = jax.random.split(key, 5)
        w_ih = _xavier_uniform(k1, (4 * output_size, in_dim), math.sqrt(2.0))
        w_hh = _xavier_uniform(k2, (4 * output_size, output_size), math.sqrt(2.0))
        b_ih = jax.random.uniform(k3, (4 * output_size,), jnp.float32, -k, k)
        b_hh = jax.random.uniform(k4, (4 * output_size,), jnp.float32, -k, k)
        params.append((w_ih, w_hh, b_ih, b_hh))
    return params


if __name__ == "__main__":
    # Small shapes implied by the forward: (batch, seq, hidden_size) input.
    B, T = 2, 8
    hidden_size = 32   # input feature dim of the decoder LSTM
    output_size = 32   # LSTM hidden/output dim
    num_layers = 1

    key = jax.random.PRNGKey(0)
    key, kx = jax.random.split(key)
    x = jax.random.normal(kx, (B, T, hidden_size), dtype=jnp.float32)

    params = make_params(key, hidden_size, output_size, num_layers)

    fwd = jax.jit(decoder_rnn_forward)
    out = fwd(x, params)
    out = jax.block_until_ready(out)

    assert out.shape == (B, T, output_size)
    assert bool(jnp.all(jnp.isfinite(out)))
    # sigmoid output must lie in (0, 1)
    assert bool(jnp.all((out > 0.0) & (out < 1.0)))
    print("KERNEL_OK")
</pallas_src>

<mosaic_0001>
module attributes {stable_mosaic.version = 11 : i64} {
  func.func @_lstm_layer_kernel(%arg0: memref<64x32xbf16, #tpu.memory_space<vmem>>, %arg1: memref<32x512xbf16, #tpu.memory_space<vmem>>, %arg2: memref<128x512xbf16, #tpu.memory_space<vmem>>, %arg3: memref<1x512xf32, #tpu.memory_space<vmem>>, %arg4: memref<64x128xf32, #tpu.memory_space<vmem>>, %arg5: memref<64x512xf32, #tpu.memory_space<vmem>>, %arg6: memref<8x128xf32, #tpu.memory_space<vmem>>, %arg7: memref<8x128xf32, #tpu.memory_space<vmem>>) attributes {dimension_semantics = [], scalar_prefetch = 0 : i64, scratch_operands = 3 : i64, tpu.core_type = #tpu.core_type<tc>} {
    %c0 = arith.constant 0 : index
    %c0_0 = arith.constant 0 : index
    %0 = vector.load %arg0[%c0, %c0_0] : memref<64x32xbf16, #tpu.memory_space<vmem>>, vector<64x32xbf16>
    %c0_1 = arith.constant 0 : index
    %c0_2 = arith.constant 0 : index
    %1 = vector.load %arg1[%c0_1, %c0_2] : memref<32x512xbf16, #tpu.memory_space<vmem>>, vector<32x512xbf16>
    %cst = arith.constant dense<0.000000e+00> : vector<64x512xf32>
    %2 = tpu.matmul %0, %1, %cst {dimension_numbers = #tpu.dot_dimension_numbers<[1], [0], [0], [1], [0, 0, 1, 1], [], []>} : vector<64x32xbf16>, vector<32x512xbf16>, vector<64x512xf32> -> vector<64x512xf32>
    %c0_3 = arith.constant 0 : index
    %c0_4 = arith.constant 0 : index
    %3 = vector.load %arg3[%c0_3, %c0_4] : memref<1x512xf32, #tpu.memory_space<vmem>>, vector<1x512xf32>
    %4 = vector.broadcast %3 : vector<1x512xf32> to vector<64x512xf32>
    %5 = arith.addf %2, %4 : vector<64x512xf32>
    %c0_5 = arith.constant 0 : index
    %c0_6 = arith.constant 0 : index
    %6 = vector.load %arg5[%c0_5, %c0_6] : memref<64x512xf32, #tpu.memory_space<vmem>>, vector<64x512xf32>
    tpu.vector_store %arg5[%c0_5, %c0_6], %5 {strides = array<i32>} : memref<64x512xf32, #tpu.memory_space<vmem>>, vector<64x512xf32>,
    %cst_7 = arith.constant 0.000000e+00 : f32
    %7 = vector.broadcast %cst_7 : f32 to vector<8x128xf32>
    %c0_8 = arith.constant 0 : index
    %c0_9 = arith.constant 0 : index
    %8 = vector.load %arg6[%c0_8, %c0_9] : memref<8x128xf32, #tpu.memory_space<vmem>>, vector<8x128xf32>
    tpu.vector_store %arg6[%c0_8, %c0_9], %7 {strides = array<i32>} : memref<8x128xf32, #tpu.memory_space<vmem>>, vector<8x128xf32>,
    %cst_10 = arith.constant 0.000000e+00 : f32
    %9 = vector.broadcast %cst_10 : f32 to vector<8x128xf32>
    %c0_11 = arith.constant 0 : index
    %c0_12 = arith.constant 0 : index
    %10 = vector.load %arg7[%c0_11, %c0_12] : memref<8x128xf32, #tpu.memory_space<vmem>>, vector<8x128xf32>
    tpu.vector_store %arg7[%c0_11, %c0_12], %9 {strides = array<i32>} : memref<8x128xf32, #tpu.memory_space<vmem>>, vector<8x128xf32>,
    %c0_i32 = arith.constant 0 : i32
    %c8_i32 = arith.constant 8 : i32
    %11 = arith.muli %c0_i32, %c8_i32 : i32
    %12 = tpu.assume_multiple %11, 8 : i32
    %13 = arith.index_cast %12 : i32 to index
    %c0_13 = arith.constant 0 : index
    %14 = vector.load %arg5[%13, %c0_13] : memref<64x512xf32, #tpu.memory_space<vmem>>, vector<8x512xf32>
    %c0_14 = arith.constant 0 : index
    %c0_15 = arith.constant 0 : index
    %15 = vector.load %arg6[%c0_14, %c0_15] : memref<8x128xf32, #tpu.memory_space<vmem>>, vector<8x128xf32>
    %16 = arith.truncf %15 : vector<8x128xf32> to vector<8x128xbf16>
    %c0_16 = arith.constant 0 : index
    %c0_17 = arith.constant 0 : index
    %17 = vector.load %arg2[%c0_16, %c0_17] : memref<128x512xbf16, #tpu.memory_space<vmem>>, vector<128x512xbf16>
    %cst_18 = arith.constant dense<0.000000e+00> : vector<8x512xf32>
    %18 = tpu.matmul %16, %17, %cst_18 {dimension_numbers = #tpu.dot_dimension_numbers<[1], [0], [0], [1], [0, 0, 1, 1], [], []>} : vector<8x128xbf16>, vector<128x512xbf16>, vector<8x512xf32> -> vector<8x512xf32>
    %19 = arith.addf %14, %18 : vector<8x512xf32>
    %20 = vector.extract_strided_slice %19 {offsets = [0, 0], sizes = [8, 128], strides = [1, 1]} : vector<8x512xf32> to vector<8x128xf32>
    %21 = arith.negf %20 : vector<8x128xf32>
    %22 = math.exp %21 : vector<8x128xf32>
    %cst_19 = arith.constant 1.000000e+00 : f32
    %23 = vector.broadcast %cst_19 : f32 to vector<8x128xf32>
    %24 = arith.addf %23, %22 : vector<8x128xf32>
    %25 = arith.divf %23, %24 : vector<8x128xf32>
    %26 = vector.extract_strided_slice %19 {offsets = [0, 128], sizes = [8, 128], strides = [1, 1]} : vector<8x512xf32> to vector<8x128xf32>
    %27 = arith.negf %26 : vector<8x128xf32>
    %28 = math.exp %27 : vector<8x128xf32>
    %cst_20 = arith.constant 1.000000e+00 : f32
    %29 = vector.broadcast %cst_20 : f32 to vector<8x128xf32>
    %30 = arith.addf %29, %28 : vector<8x128xf32>
    %31 = arith.divf %29, %30 : vector<8x128xf32>
    %32 = vector.extract_strided_slice %19 {offsets = [0, 256], sizes = [8, 128], strides = [1, 1]} : vector<8x512xf32> to vector<8x128xf32>
    %33 = math.tanh %32 : vector<8x128xf32>
    %34 = vector.extract_strided_slice %19 {offsets = [0, 384], sizes = [8, 128], strides = [1, 1]} : vector<8x512xf32> to vector<8x128xf32>
    %35 = arith.negf %34 : vector<8x128xf32>
    %36 = math.exp %35 : vector<8x128xf32>
    %cst_21 = arith.constant 1.000000e+00 : f32
    %37 = vector.broadcast %cst_21 : f32 to vector<8x128xf32>
    %38 = arith.addf %37, %36 : vector<8x128xf32>
    %39 = arith.divf %37, %38 : vector<8x128xf32>
    %c0_22 = arith.constant 0 : index
    %c0_23 = arith.constant 0 : index
    %40 = vector.load %arg7[%c0_22, %c0_23] : memref<8x128xf32, #tpu.memory_space<vmem>>, vector<8x128xf32>
    %41 = arith.mulf %31, %40 : vector<8x128xf32>
    %42 = arith.mulf %25, %33 : vector<8x128xf32>
    %43 = arith.addf %41, %42 : vector<8x128xf32>
    %44 = math.tanh %43 : vector<8x128xf32>
    %45 = arith.mulf %39, %44 : vector<8x128xf32>
    %c0_24 = arith.constant 0 : index
    %c0_25 = arith.constant 0 : index
    %46 = vector.load %arg7[%c0_24, %c0_25] : memref<8x128xf32, #tpu.memory_space<vmem>>, vector<8x128xf32>
    tpu.vector_store %arg7[%c0_24, %c0_25], %43 {strides = array<i32>} : memref<8x128xf32, #tpu.memory_space<vmem>>, vector<8x128xf32>,
    %c0_26 = arith.constant 0 : index
    %c0_27 = arith.constant 0 : index
    %47 = vector.load %arg6[%c0_26, %c0_27] : memref<8x128xf32, #tpu.memory_space<vmem>>, vector<8x128xf32>
    tpu.vector_store %arg6[%c0_26, %c0_27], %45 {strides = array<i32>} : memref<8x128xf32, #tpu.memory_space<vmem>>, vector<8x128xf32>,
    %48 = arith.negf %45 : vector<8x128xf32>
    %49 = math.exp %48 : vector<8x128xf32>
    %cst_28 = arith.constant 1.000000e+00 : f32
    %50 = vector.broadcast %cst_28 : f32 to vector<8x128xf32>
    %51 = arith.addf %50, %49 : vector<8x128xf32>
    %52 = arith.divf %50, %51 : vector<8x128xf32>
    %53 = arith.index_cast %12 : i32 to index
    %c0_29 = arith.constant 0 : index
    %54 = vector.load %arg4[%53, %c0_29] : memref<64x128xf32, #tpu.memory_space<vmem>>, vector<8x128xf32>
    tpu.vector_store %arg4[%53, %c0_29], %52 {strides = array<i32>} : memref<64x128xf32, #tpu.memory_space<vmem>>, vector<8x128xf32>,
    %c1_i32 = arith.constant 1 : i32
    %c8_i32_30 = arith.constant 8 : i32
    %55 = arith.muli %c1_i32, %c8_i32_30 : i32
    %56 = tpu.assume_multiple %55, 8 : i32
    %57 = arith.index_cast %56 : i32 to index
    %c0_31 = arith.constant 0 : index
    %58 = vector.load %arg5[%57, %c0_31] : memref<64x512xf32, #tpu.memory_space<vmem>>, vector<8x512xf32>
    %c0_32 = arith.constant 0 : index
    %c0_33 = arith.constant 0 : index
    %59 = vector.load %arg6[%c0_32, %c0_33] : memref<8x128xf32, #tpu.memory_space<vmem>>, vector<8x128xf32>
    %60 = arith.truncf %59 : vector<8x128xf32> to vector<8x128xbf16>
    %c0_34 = arith.constant 0 : index
    %c0_35 = arith.constant 0 : index
    %61 = vector.load %arg2[%c0_34, %c0_35] : memref<128x512xbf16, #tpu.memory_space<vmem>>, vector<128x512xbf16>
    %cst_36 = arith.constant dense<0.000000e+00> : vector<8x512xf32>
    %62 = tpu.matmul %60, %61, %cst_36 {dimension_numbers = #tpu.dot_dimension_numbers<[1], [0], [0], [1], [0, 0, 1, 1], [], []>} : vector<8x128xbf16>, vector<128x512xbf16>, vector<8x512xf32> -> vector<8x512xf32>
    %63 = arith.addf %58, %62 : vector<8x512xf32>
    %64 = vector.extract_strided_slice %63 {offsets = [0, 0], sizes = [8, 128], strides = [1, 1]} : vector<8x512xf32> to vector<8x128xf32>
    %65 = arith.negf %64 : vector<8x128xf32>
    %66 = math.exp %65 : vector<8x128xf32>
    %cst_37 = arith.constant 1.000000e+00 : f32
    %67 = vector.broadcast %cst_37 : f32 to vector<8x128xf32>
    %68 = arith.addf %67, %66 : vector<8x128xf32>
    %69 = arith.divf %67, %68 : vector<8x128xf32>
    %70 = vector.extract_strided_slice %63 {offsets = [0, 128], sizes = [8, 128], strides = [1, 1]} : vector<8x512xf32> to vector<8x128xf32>
    %71 = arith.negf %70 : vector<8x128xf32>
    %72 = math.exp %71 : vector<8x128xf32>
    %cst_38 = arith.constant 1.000000e+00 : f32
    %73 = vector.broadcast %cst_38 : f32 to vector<8x128xf32>
    %74 = arith.addf %73, %72 : vector<8x128xf32>
    %75 = arith.divf %73, %74 : vector<8x128xf32>
    %76 = vector.extract_strided_slice %63 {offsets = [0, 256], sizes = [8, 128], strides = [1, 1]} : vector<8x512xf32> to vector<8x128xf32>
    %77 = math.tanh %76 : vector<8x128xf32>
    %78 = vector.extract_strided_slice %63 {offsets = [0, 384], sizes = [8, 128], strides = [1, 1]} : vector<8x512xf32> to vector<8x128xf32>
    %79 = arith.negf %78 : vector<8x128xf32>
    %80 = math.exp %79 : vector<8x128xf32>
    %cst_39 = arith.constant 1.000000e+00 : f32
    %81 = vector.broadcast %cst_39 : f32 to vector<8x128xf32>
    %82 = arith.addf %81, %80 : vector<8x128xf32>
    %83 = arith.divf %81, %82 : vector<8x128xf32>
    %c0_40 = arith.constant 0 : index
    %c0_41 = arith.constant 0 : index
    %84 = vector.load %arg7[%c0_40, %c0_41] : memref<8x128xf32, #tpu.memory_space<vmem>>, vector<8x128xf32>
    %85 = arith.mulf %75, %84 : vector<8x128xf32>
    %86 = arith.mulf %69, %77 : vector<8x128xf32>
    %87 = arith.addf %85, %86 : vector<8x128xf32>
    %88 = math.tanh %87 : vector<8x128xf32>
    %89 = arith.mulf %83, %88 : vector<8x128xf32>
    %c0_42 = arith.constant 0 : index
    %c0_43 = arith.constant 0 : index
    %90 = vector.load %arg7[%c0_42, %c0_43] : memref<8x128xf32, #tpu.memory_space<vmem>>, vector<8x128xf32>
    tpu.vector_store %arg7[%c0_42, %c0_43], %87 {strides = array<i32>} : memref<8x128xf32, #tpu.memory_space<vmem>>, vector<8x128xf32>,
    %c0_44 = arith.constant 0 : index
    %c0_45 = arith.constant 0 : index
    %91 = vector.load %arg6[%c0_44, %c0_45] : memref<8x128xf32, #tpu.memory_space<vmem>>, vector<8x128xf32>
    tpu.vector_store %arg6[%c0_44, %c0_45], %89 {strides = array<i32>} : memref<8x128xf32, #tpu.memory_space<vmem>>, vector<8x128xf32>,
    %92 = arith.negf %89 : vector<8x128xf32>
    %93 = math.exp %92 : vector<8x128xf32>
    %cst_46 = arith.constant 1.000000e+00 : f32
    %94 = vector.broadcast %cst_46 : f32 to vector<8x128xf32>
    %95 = arith.addf %94, %93 : vector<8x128xf32>
    %96 = arith.divf %94, %95 : vector<8x128xf32>
    %97 = arith.index_cast %56 : i32 to index
    %c0_47 = arith.constant 0 : index
    %98 = vector.load %arg4[%97, %c0_47] : memref<64x128xf32, #tpu.memory_space<vmem>>, vector<8x128xf32>
    tpu.vector_store %arg4[%97, %c0_47], %96 {strides = array<i32>} : memref<64x128xf32, #tpu.memory_space<vmem>>, vector<8x128xf32>,
    %c2_i32 = arith.constant 2 : i32
    %c8_i32_48 = arith.constant 8 : i32
    %99 = arith.muli %c2_i32, %c8_i32_48 : i32
    %100 = tpu.assume_multiple %99, 8 : i32
    %101 = arith.index_cast %100 : i32 to index
    %c0_49 = arith.constant 0 : index
    %102 = vector.load %arg5[%101, %c0_49] : memref<64x512xf32, #tpu.memory_space<vmem>>, vector<8x512xf32>
    %c0_50 = arith.constant 0 : index
    %c0_51 = arith.constant 0 : index
    %103 = vector.load %arg6[%c0_50, %c0_51] : memref<8x128xf32, #tpu.memory_space<vmem>>, vector<8x128xf32>
    %104 = arith.truncf %103 : vector<8x128xf32> to vector<8x128xbf16>
    %c0_52 = arith.constant 0 : index
    %c0_53 = arith.constant 0 : index
    %105 = vector.load %arg2[%c0_52, %c0_53] : memref<128x512xbf16, #tpu.memory_space<vmem>>, vector<128x512xbf16>
    %cst_54 = arith.constant dense<0.000000e+00> : vector<8x512xf32>
    %106 = tpu.matmul %104, %105, %cst_54 {dimension_numbers = #tpu.dot_dimension_numbers<[1], [0], [0], [1], [0, 0, 1, 1], [], []>} : vector<8x128xbf16>, vector<128x512xbf16>, vector<8x512xf32> -> vector<8x512xf32>
    %107 = arith.addf %102, %106 : vector<8x512xf32>
    %108 = vector.extract_strided_slice %107 {offsets = [0, 0], sizes = [8, 128], strides = [1, 1]} : vector<8x512xf32> to vector<8x128xf32>
    %109 = arith.negf %108 : vector<8x128xf32>
    %110 = math.exp %109 : vector<8x128xf32>
    %cst_55 = arith.constant 1.000000e+00 : f32
    %111 = vector.broadcast %cst_55 : f32 to vector<8x128xf32>
    %112 = arith.addf %111, %110 : vector<8x128xf32>
    %113 = arith.divf %111, %112 : vector<8x128xf32>
    %114 = vector.extract_strided_slice %107 {offsets = [0, 128], sizes = [8, 128], strides = [1, 1]} : vector<8x512xf32> to vector<8x128xf32>
    %115 = arith.negf %114 : vector<8x128xf32>
    %116 = math.exp %115 : vector<8x128xf32>
    %cst_56 = arith.constant 1.000000e+00 : f32
    %117 = vector.broadcast %cst_56 : f32 to vector<8x128xf32>
    %118 = arith.addf %117, %116 : vector<8x128xf32>
    %119 = arith.divf %117, %118 : vector<8x128xf32>
    %120 = vector.extract_strided_slice %107 {offsets = [0, 256], sizes = [8, 128], strides = [1, 1]} : vector<8x512xf32> to vector<8x128xf32>
    %121 = math.tanh %120 : vector<8x128xf32>
    %122 = vector.extract_strided_slice %107 {offsets = [0, 384], sizes = [8, 128], strides = [1, 1]} : vector<8x512xf32> to vector<8x128xf32>
    %123 = arith.negf %122 : vector<8x128xf32>
    %124 = math.exp %123 : vector<8x128xf32>
    %cst_57 = arith.constant 1.000000e+00 : f32
    %125 = vector.broadcast %cst_57 : f32 to vector<8x128xf32>
    %126 = arith.addf %125, %124 : vector<8x128xf32>
    %127 = arith.divf %125, %126 : vector<8x128xf32>
    %c0_58 = arith.constant 0 : index
    %c0_59 = arith.constant 0 : index
    %128 = vector.load %arg7[%c0_58, %c0_59] : memref<8x128xf32, #tpu.memory_space<vmem>>, vector<8x128xf32>
    %129 = arith.mulf %119, %128 : vector<8x128xf32>
    %130 = arith.mulf %113, %121 : vector<8x128xf32>
    %131 = arith.addf %129, %130 : vector<8x128xf32>
    %132 = math.tanh %131 : vector<8x128xf32>
    %133 = arith.mulf %127, %132 : vector<8x128xf32>
    %c0_60 = arith.constant 0 : index
    %c0_61 = arith.constant 0 : index
    %134 = vector.load %arg7[%c0_60, %c0_61] : memref<8x128xf32, #tpu.memory_space<vmem>>, vector<8x128xf32>
    tpu.vector_store %arg7[%c0_60, %c0_61], %131 {strides = array<i32>} : memref<8x128xf32, #tpu.memory_space<vmem>>, vector<8x128xf32>,
    %c0_62 = arith.constant 0 : index
    %c0_63 = arith.constant 0 : index
    %135 = vector.load %arg6[%c0_62, %c0_63] : memref<8x128xf32, #tpu.memory_space<vmem>>, vector<8x128xf32>
    tpu.vector_store %arg6[%c0_62, %c0_63], %133 {strides = array<i32>} : memref<8x128xf32, #tpu.memory_space<vmem>>, vector<8x128xf32>,
    %136 = arith.negf %133 : vector<8x128xf32>
    %137 = math.exp %136 : vector<8x128xf32>
    %cst_64 = arith.constant 1.000000e+00 : f32
    %138 = vector.broadcast %cst_64 : f32 to vector<8x128xf32>
    %139 = arith.addf %138, %137 : vector<8x128xf32>
    %140 = arith.divf %138, %139 : vector<8x128xf32>
    %141 = arith.index_cast %100 : i32 to index
    %c0_65 = arith.constant 0 : index
    %142 = vector.load %arg4[%141, %c0_65] : memref<64x128xf32, #tpu.memory_space<vmem>>, vector<8x128xf32>
    tpu.vector_store %arg4[%141, %c0_65], %140 {strides = array<i32>} : memref<64x128xf32, #tpu.memory_space<vmem>>, vector<8x128xf32>,
    %c3_i32 = arith.constant 3 : i32
    %c8_i32_66 = arith.constant 8 : i32
    %143 = arith.muli %c3_i32, %c8_i32_66 : i32
    %144 = tpu.assume_multiple %143, 8 : i32
    %145 = arith.index_cast %144 : i32 to index
    %c0_67 = arith.constant 0 : index
    %146 = vector.load %arg5[%145, %c0_67] : memref<64x512xf32, #tpu.memory_space<vmem>>, vector<8x512xf32>
    %c0_68 = arith.constant 0 : index
    %c0_69 = arith.constant 0 : index
    %147 = vector.load %arg6[%c0_68, %c0_69] : memref<8x128xf32, #tpu.memory_space<vmem>>, vector<8x128xf32>
    %148 = arith.truncf %147 : vector<8x128xf32> to vector<8x128xbf16>
    %c0_70 = arith.constant 0 : index
    %c0_71 = arith.constant 0 : index
    %149 = vector.load %arg2[%c0_70, %c0_71] : memref<128x512xbf16, #tpu.memory_space<vmem>>, vector<128x512xbf16>
    %cst_72 = arith.constant dense<0.000000e+00> : vector<8x512xf32>
    %150 = tpu.matmul %148, %149, %cst_72 {dimension_numbers = #tpu.dot_dimension_numbers<[1], [0], [0], [1], [0, 0, 1, 1], [], []>} : vector<8x128xbf16>, vector<128x512xbf16>, vector<8x512xf32> -> vector<8x512xf32>
    %151 = arith.addf %146, %150 : vector<8x512xf32>
    %152 = vector.extract_strided_slice %151 {offsets = [0, 0], sizes = [8, 128], strides = [1, 1]} : vector<8x512xf32> to vector<8x128xf32>
    %153 = arith.negf %152 : vector<8x128xf32>
    %154 = math.exp %153 : vector<8x128xf32>
    %cst_73 = arith.constant 1.000000e+00 : f32
    %155 = vector.broadcast %cst_73 : f32 to vector<8x128xf32>
    %156 = arith.addf %155, %154 : vector<8x128xf32>
    %157 = arith.divf %155, %156 : vector<8x128xf32>
    %158 = vector.extract_strided_slice %151 {offsets = [0, 128], sizes = [8, 128], strides = [1, 1]} : vector<8x512xf32> to vector<8x128xf32>
    %159 = arith.negf %158 : vector<8x128xf32>
    %160 = math.exp %159 : vector<8x128xf32>
    %cst_74 = arith.constant 1.000000e+00 : f32
    %161 = vector.broadcast %cst_74 : f32 to vector<8x128xf32>
    %162 = arith.addf %161, %160 : vector<8x128xf32>
    %163 = arith.divf %161, %162 : vector<8x128xf32>
    %164 = vector.extract_strided_slice %151 {offsets = [0, 256], sizes = [8, 128], strides = [1, 1]} : vector<8x512xf32> to vector<8x128xf32>
    %165 = math.tanh %164 : vector<8x128xf32>
    %166 = vector.extract_strided_slice %151 {offsets = [0, 384], sizes = [8, 128], strides = [1, 1]} : vector<8x512xf32> to vector<8x128xf32>
    %167 = arith.negf %166 : vector<8x128xf32>
    %168 = math.exp %167 : vector<8x128xf32>
    %cst_75 = arith.constant 1.000000e+00 : f32
    %169 = vector.broadcast %cst_75 : f32 to vector<8x128xf32>
    %170 = arith.addf %169, %168 : vector<8x128xf32>
    %171 = arith.divf %169, %170 : vector<8x128xf32>
    %c0_76 = arith.constant 0 : index
    %c0_77 = arith.constant 0 : index
    %172 = vector.load %arg7[%c0_76, %c0_77] : memref<8x128xf32, #tpu.memory_space<vmem>>, vector<8x128xf32>
    %173 = arith.mulf %163, %172 : vector<8x128xf32>
    %174 = arith.mulf %157, %165 : vector<8x128xf32>
    %175 = arith.addf %173, %174 : vector<8x128xf32>
    %176 = math.tanh %175 : vector<8x128xf32>
    %177 = arith.mulf %171, %176 : vector<8x128xf32>
    %c0_78 = arith.constant 0 : index
    %c0_79 = arith.constant 0 : index
    %178 = vector.load %arg7[%c0_78, %c0_79] : memref<8x128xf32, #tpu.memory_space<vmem>>, vector<8x128xf32>
    tpu.vector_store %arg7[%c0_78, %c0_79], %175 {strides = array<i32>} : memref<8x128xf32, #tpu.memory_space<vmem>>, vector<8x128xf32>,
    %c0_80 = arith.constant 0 : index
    %c0_81 = arith.constant 0 : index
    %179 = vector.load %arg6[%c0_80, %c0_81] : memref<8x128xf32, #tpu.memory_space<vmem>>, vector<8x128xf32>
    tpu.vector_store %arg6[%c0_80, %c0_81], %177 {strides = array<i32>} : memref<8x128xf32, #tpu.memory_space<vmem>>, vector<8x128xf32>,
    %180 = arith.negf %177 : vector<8x128xf32>
    %181 = math.exp %180 : vector<8x128xf32>
    %cst_82 = arith.constant 1.000000e+00 : f32
    %182 = vector.broadcast %cst_82 : f32 to vector<8x128xf32>
    %183 = arith.addf %182, %181 : vector<8x128xf32>
    %184 = arith.divf %182, %183 : vector<8x128xf32>
    %185 = arith.index_cast %144 : i32 to index
    %c0_83 = arith.constant 0 : index
    %186 = vector.load %arg4[%185, %c0_83] : memref<64x128xf32, #tpu.memory_space<vmem>>, vector<8x128xf32>
    tpu.vector_store %arg4[%185, %c0_83], %184 {strides = array<i32>} : memref<64x128xf32, #tpu.memory_space<vmem>>, vector<8x128xf32>,
    %c4_i32 = arith.constant 4 : i32
    %c8_i32_84 = arith.constant 8 : i32
    %187 = arith.muli %c4_i32, %c8_i32_84 : i32
    %188 = tpu.assume_multiple %187, 8 : i32
    %189 = arith.index_cast %188 : i32 to index
    %c0_85 = arith.constant 0 : index
    %190 = vector.load %arg5[%189, %c0_85] : memref<64x512xf32, #tpu.memory_space<vmem>>, vector<8x512xf32>
    %c0_86 = arith.constant 0 : index
    %c0_87 = arith.constant 0 : index
    %191 = vector.load %arg6[%c0_86, %c0_87] : memref<8x128xf32, #tpu.memory_space<vmem>>, vector<8x128xf32>
    %192 = arith.truncf %191 : vector<8x128xf32> to vector<8x128xbf16>
    %c0_88 = arith.constant 0 : index
    %c0_89 = arith.constant 0 : index
    %193 = vector.load %arg2[%c0_88, %c0_89] : memref<128x512xbf16, #tpu.memory_space<vmem>>, vector<128x512xbf16>
    %cst_90 = arith.constant dense<0.000000e+00> : vector<8x512xf32>
    %194 = tpu.matmul %192, %193, %cst_90 {dimension_numbers = #tpu.dot_dimension_numbers<[1], [0], [0], [1], [0, 0, 1, 1], [], []>} : vector<8x128xbf16>, vector<128x512xbf16>, vector<8x512xf32> -> vector<8x512xf32>
    %195 = arith.addf %190, %194 : vector<8x512xf32>
    %196 = vector.extract_strided_slice %195 {offsets = [0, 0], sizes = [8, 128], strides = [1, 1]} : vector<8x512xf32> to vector<8x128xf32>
    %197 = arith.negf %196 : vector<8x128xf32>
    %198 = math.exp %197 : vector<8x128xf32>
    %cst_91 = arith.constant 1.000000e+00 : f32
    %199 = vector.broadcast %cst_91 : f32 to vector<8x128xf32>
    %200 = arith.addf %199, %198 : vector<8x128xf32>
    %201 = arith.divf %199, %200 : vector<8x128xf32>
    %202 = vector.extract_strided_slice %195 {offsets = [0, 128], sizes = [8, 128], strides = [1, 1]} : vector<8x512xf32> to vector<8x128xf32>
    %203 = arith.negf %202 : vector<8x128xf32>
    %204 = math.exp %203 : vector<8x128xf32>
    %cst_92 = arith.constant 1.000000e+00 : f32
    %205 = vector.broadcast %cst_92 : f32 to vector<8x128xf32>
    %206 = arith.addf %205, %204 : vector<8x128xf32>
    %207 = arith.divf %205, %206 : vector<8x128xf32>
    %208 = vector.extract_strided_slice %195 {offsets = [0, 256], sizes = [8, 128], strides = [1, 1]} : vector<8x512xf32> to vector<8x128xf32>
    %209 = math.tanh %208 : vector<8x128xf32>
    %210 = vector.extract_strided_slice %195 {offsets = [0, 384], sizes = [8, 128], strides = [1, 1]} : vector<8x512xf32> to vector<8x128xf32>
    %211 = arith.negf %210 : vector<8x128xf32>
    %212 = math.exp %211 : vector<8x128xf32>
    %cst_93 = arith.constant 1.000000e+00 : f32
    %213 = vector.broadcast %cst_93 : f32 to vector<8x128xf32>
    %214 = arith.addf %213, %212 : vector<8x128xf32>
    %215 = arith.divf %213, %214 : vector<8x128xf32>
    %c0_94 = arith.constant 0 : index
    %c0_95 = arith.constant 0 : index
    %216 = vector.load %arg7[%c0_94, %c0_95] : memref<8x128xf32, #tpu.memory_space<vmem>>, vector<8x128xf32>
    %217 = arith.mulf %207, %216 : vector<8x128xf32>
    %218 = arith.mulf %201, %209 : vector<8x128xf32>
    %219 = arith.addf %217, %218 : vector<8x128xf32>
    %220 = math.tanh %219 : vector<8x128xf32>
    %221 = arith.mulf %215, %220 : vector<8x128xf32>
    %c0_96 = arith.constant 0 : index
    %c0_97 = arith.constant 0 : index
    %222 = vector.load %arg7[%c0_96, %c0_97] : memref<8x128xf32, #tpu.memory_space<vmem>>, vector<8x128xf32>
    tpu.vector_store %arg7[%c0_96, %c0_97], %219 {strides = array<i32>} : memref<8x128xf32, #tpu.memory_space<vmem>>, vector<8x128xf32>,
    %c0_98 = arith.constant 0 : index
    %c0_99 = arith.constant 0 : index
    %223 = vector.load %arg6[%c0_98, %c0_99] : memref<8x128xf32, #tpu.memory_space<vmem>>, vector<8x128xf32>
    tpu.vector_store %arg6[%c0_98, %c0_99], %221 {strides = array<i32>} : memref<8x128xf32, #tpu.memory_space<vmem>>, vector<8x128xf32>,
    %224 = arith.negf %221 : vector<8x128xf32>
    %225 = math.exp %224 : vector<8x128xf32>
    %cst_100 = arith.constant 1.000000e+00 : f32
    %226 = vector.broadcast %cst_100 : f32 to vector<8x128xf32>
    %227 = arith.addf %226, %225 : vector<8x128xf32>
    %228 = arith.divf %226, %227 : vector<8x128xf32>
    %229 = arith.index_cast %188 : i32 to index
    %c0_101 = arith.constant 0 : index
    %230 = vector.load %arg4[%229, %c0_101] : memref<64x128xf32, #tpu.memory_space<vmem>>, vector<8x128xf32>
    tpu.vector_store %arg4[%229, %c0_101], %228 {strides = array<i32>} : memref<64x128xf32, #tpu.memory_space<vmem>>, vector<8x128xf32>,
    %c5_i32 = arith.constant 5 : i32
    %c8_i32_102 = arith.constant 8 : i32
    %231 = arith.muli %c5_i32, %c8_i32_102 : i32
    %232 = tpu.assume_multiple %231, 8 : i32
    %233 = arith.index_cast %232 : i32 to index
    %c0_103 = arith.constant 0 : index
    %234 = vector.load %arg5[%233, %c0_103] : memref<64x512xf32, #tpu.memory_space<vmem>>, vector<8x512xf32>
    %c0_104 = arith.constant 0 : index
    %c0_105 = arith.constant 0 : index
    %235 = vector.load %arg6[%c0_104, %c0_105] : memref<8x128xf32, #tpu.memory_space<vmem>>, vector<8x128xf32>
    %236 = arith.truncf %235 : vector<8x128xf32> to vector<8x128xbf16>
    %c0_106 = arith.constant 0 : index
    %c0_107 = arith.constant 0 : index
    %237 = vector.load %arg2[%c0_106, %c0_107] : memref<128x512xbf16, #tpu.memory_space<vmem>>, vector<128x512xbf16>
    %cst_108 = arith.constant dense<0.000000e+00> : vector<8x512xf32>
    %238 = tpu.matmul %236, %237, %cst_108 {dimension_numbers = #tpu.dot_dimension_numbers<[1], [0], [0], [1], [0, 0, 1, 1], [], []>} : vector<8x128xbf16>, vector<128x512xbf16>, vector<8x512xf32> -> vector<8x512xf32>
    %239 = arith.addf %234, %238 : vector<8x512xf32>
    %240 = vector.extract_strided_slice %239 {offsets = [0, 0], sizes = [8, 128], strides = [1, 1]} : vector<8x512xf32> to vector<8x128xf32>
    %241 = arith.negf %240 : vector<8x128xf32>
    %242 = math.exp %241 : vector<8x128xf32>
    %cst_109 = arith.constant 1.000000e+00 : f32
    %243 = vector.broadcast %cst_109 : f32 to vector<8x128xf32>
    %244 = arith.addf %243, %242 : vector<8x128xf32>
    %245 = arith.divf %243, %244 : vector<8x128xf32>
    %246 = vector.extract_strided_slice %239 {offsets = [0, 128], sizes = [8, 128], strides = [1, 1]} : vector<8x512xf32> to vector<8x128xf32>
    %247 = arith.negf %246 : vector<8x128xf32>
    %248 = math.exp %247 : vector<8x128xf32>
    %cst_110 = arith.constant 1.000000e+00 : f32
    %249 = vector.broadcast %cst_110 : f32 to vector<8x128xf32>
    %250 = arith.addf %249, %248 : vector<8x128xf32>
    %251 = arith.divf %249, %250 : vector<8x128xf32>
    %252 = vector.extract_strided_slice %239 {offsets = [0, 256], sizes = [8, 128], strides = [1, 1]} : vector<8x512xf32> to vector<8x128xf32>
    %253 = math.tanh %252 : vector<8x128xf32>
    %254 = vector.extract_strided_slice %239 {offsets = [0, 384], sizes = [8, 128], strides = [1, 1]} : vector<8x512xf32> to vector<8x128xf32>
    %255 = arith.negf %254 : vector<8x128xf32>
    %256 = math.exp %255 : vector<8x128xf32>
    %cst_111 = arith.constant 1.000000e+00 : f32
    %257 = vector.broadcast %cst_111 : f32 to vector<8x128xf32>
    %258 = arith.addf %257, %256 : vector<8x128xf32>
    %259 = arith.divf %257, %258 : vector<8x128xf32>
    %c0_112 = arith.constant 0 : index
    %c0_113 = arith.constant 0 : index
    %260 = vector.load %arg7[%c0_112, %c0_113] : memref<8x128xf32, #tpu.memory_space<vmem>>, vector<8x128xf32>
    %261 = arith.mulf %251, %260 : vector<8x128xf32>
    %262 = arith.mulf %245, %253 : vector<8x128xf32>
    %263 = arith.addf %261, %262 : vector<8x128xf32>
    %264 = math.tanh %263 : vector<8x128xf32>
    %265 = arith.mulf %259, %264 : vector<8x128xf32>
    %c0_114 = arith.constant 0 : index
    %c0_115 = arith.constant 0 : index
    %266 = vector.load %arg7[%c0_114, %c0_115] : memref<8x128xf32, #tpu.memory_space<vmem>>, vector<8x128xf32>
    tpu.vector_store %arg7[%c0_114, %c0_115], %263 {strides = array<i32>} : memref<8x128xf32, #tpu.memory_space<vmem>>, vector<8x128xf32>,
    %c0_116 = arith.constant 0 : index
    %c0_117 = arith.constant 0 : index
    %267 = vector.load %arg6[%c0_116, %c0_117] : memref<8x128xf32, #tpu.memory_space<vmem>>, vector<8x128xf32>
    tpu.vector_store %arg6[%c0_116, %c0_117], %265 {strides = array<i32>} : memref<8x128xf32, #tpu.memory_space<vmem>>, vector<8x128xf32>,
    %268 = arith.negf %265 : vector<8x128xf32>
    %269 = math.exp %268 : vector<8x128xf32>
    %cst_118 = arith.constant 1.000000e+00 : f32
    %270 = vector.broadcast %cst_118 : f32 to vector<8x128xf32>
    %271 = arith.addf %270, %269 : vector<8x128xf32>
    %272 = arith.divf %270, %271 : vector<8x128xf32>
    %273 = arith.index_cast %232 : i32 to index
    %c0_119 = arith.constant 0 : index
    %274 = vector.load %arg4[%273, %c0_119] : memref<64x128xf32, #tpu.memory_space<vmem>>, vector<8x128xf32>
    tpu.vector_store %arg4[%273, %c0_119], %272 {strides = array<i32>} : memref<64x128xf32, #tpu.memory_space<vmem>>, vector<8x128xf32>,
    %c6_i32 = arith.constant 6 : i32
    %c8_i32_120 = arith.constant 8 : i32
    %275 = arith.muli %c6_i32, %c8_i32_120 : i32
    %276 = tpu.assume_multiple %275, 8 : i32
    %277 = arith.index_cast %276 : i32 to index
    %c0_121 = arith.constant 0 : index
    %278 = vector.load %arg5[%277, %c0_121] : memref<64x512xf32, #tpu.memory_space<vmem>>, vector<8x512xf32>
    %c0_122 = arith.constant 0 : index
    %c0_123 = arith.constant 0 : index
    %279 = vector.load %arg6[%c0_122, %c0_123] : memref<8x128xf32, #tpu.memory_space<vmem>>, vector<8x128xf32>
    %280 = arith.truncf %279 : vector<8x128xf32> to vector<8x128xbf16>
    %c0_124 = arith.constant 0 : index
    %c0_125 = arith.constant 0 : index
    %281 = vector.load %arg2[%c0_124, %c0_125] : memref<128x512xbf16, #tpu.memory_space<vmem>>, vector<128x512xbf16>
    %cst_126 = arith.constant dense<0.000000e+00> : vector<8x512xf32>
    %282 = tpu.matmul %280, %281, %cst_126 {dimension_numbers = #tpu.dot_dimension_numbers<[1], [0], [0], [1], [0, 0, 1, 1], [], []>} : vector<8x128xbf16>, vector<128x512xbf16>, vector<8x512xf32> -> vector<8x512xf32>
    %283 = arith.addf %278, %282 : vector<8x512xf32>
    %284 = vector.extract_strided_slice %283 {offsets = [0, 0], sizes = [8, 128], strides = [1, 1]} : vector<8x512xf32> to vector<8x128xf32>
    %285 = arith.negf %284 : vector<8x128xf32>
    %286 = math.exp %285 : vector<8x128xf32>
    %cst_127 = arith.constant 1.000000e+00 : f32
    %287 = vector.broadcast %cst_127 : f32 to vector<8x128xf32>
    %288 = arith.addf %287, %286 : vector<8x128xf32>
    %289 = arith.divf %287, %288 : vector<8x128xf32>
    %290 = vector.extract_strided_slice %283 {offsets = [0, 128], sizes = [8, 128], strides = [1, 1]} : vector<8x512xf32> to vector<8x128xf32>
    %291 = arith.negf %290 : vector<8x128xf32>
    %292 = math.exp %291 : vector<8x128xf32>
    %cst_128 = arith.constant 1.000000e+00 : f32
    %293 = vector.broadcast %cst_128 : f32 to vector<8x128xf32>
    %294 = arith.addf %293, %292 : vector<8x128xf32>
    %295 = arith.divf %293, %294 : vector<8x128xf32>
    %296 = vector.extract_strided_slice %283 {offsets = [0, 256], sizes = [8, 128], strides = [1, 1]} : vector<8x512xf32> to vector<8x128xf32>
    %297 = math.tanh %296 : vector<8x128xf32>
    %298 = vector.extract_strided_slice %283 {offsets = [0, 384], sizes = [8, 128], strides = [1, 1]} : vector<8x512xf32> to vector<8x128xf32>
    %299 = arith.negf %298 : vector<8x128xf32>
    %300 = math.exp %299 : vector<8x128xf32>
    %cst_129 = arith.constant 1.000000e+00 : f32
    %301 = vector.broadcast %cst_129 : f32 to vector<8x128xf32>
    %302 = arith.addf %301, %300 : vector<8x128xf32>
    %303 = arith.divf %301, %302 : vector<8x128xf32>
    %c0_130 = arith.constant 0 : index
    %c0_131 = arith.constant 0 : index
    %304 = vector.load %arg7[%c0_130, %c0_131] : memref<8x128xf32, #tpu.memory_space<vmem>>, vector<8x128xf32>
    %305 = arith.mulf %295, %304 : vector<8x128xf32>
    %306 = arith.mulf %289, %297 : vector<8x128xf32>
    %307 = arith.addf %305, %306 : vector<8x128xf32>
    %308 = math.tanh %307 : vector<8x128xf32>
    %309 = arith.mulf %303, %308 : vector<8x128xf32>
    %c0_132 = arith.constant 0 : index
    %c0_133 = arith.constant 0 : index
    %310 = vector.load %arg7[%c0_132, %c0_133] : memref<8x128xf32, #tpu.memory_space<vmem>>, vector<8x128xf32>
    tpu.vector_store %arg7[%c0_132, %c0_133], %307 {strides = array<i32>} : memref<8x128xf32, #tpu.memory_space<vmem>>, vector<8x128xf32>,
    %c0_134 = arith.constant 0 : index
    %c0_135 = arith.constant 0 : index
    %311 = vector.load %arg6[%c0_134, %c0_135] : memref<8x128xf32, #tpu.memory_space<vmem>>, vector<8x128xf32>
    tpu.vector_store %arg6[%c0_134, %c0_135], %309 {strides = array<i32>} : memref<8x128xf32, #tpu.memory_space<vmem>>, vector<8x128xf32>,
    %312 = arith.negf %309 : vector<8x128xf32>
    %313 = math.exp %312 : vector<8x128xf32>
    %cst_136 = arith.constant 1.000000e+00 : f32
    %314 = vector.broadcast %cst_136 : f32 to vector<8x128xf32>
    %315 = arith.addf %314, %313 : vector<8x128xf32>
    %316 = arith.divf %314, %315 : vector<8x128xf32>
    %317 = arith.index_cast %276 : i32 to index
    %c0_137 = arith.constant 0 : index
    %318 = vector.load %arg4[%317, %c0_137] : memref<64x128xf32, #tpu.memory_space<vmem>>, vector<8x128xf32>
    tpu.vector_store %arg4[%317, %c0_137], %316 {strides = array<i32>} : memref<64x128xf32, #tpu.memory_space<vmem>>, vector<8x128xf32>,
    %c7_i32 = arith.constant 7 : i32
    %c8_i32_138 = arith.constant 8 : i32
    %319 = arith.muli %c7_i32, %c8_i32_138 : i32
    %320 = tpu.assume_multiple %319, 8 : i32
    %321 = arith.index_cast %320 : i32 to index
    %c0_139 = arith.constant 0 : index
    %322 = vector.load %arg5[%321, %c0_139] : memref<64x512xf32, #tpu.memory_space<vmem>>, vector<8x512xf32>
    %c0_140 = arith.constant 0 : index
    %c0_141 = arith.constant 0 : index
    %323 = vector.load %arg6[%c0_140, %c0_141] : memref<8x128xf32, #tpu.memory_space<vmem>>, vector<8x128xf32>
    %324 = arith.truncf %323 : vector<8x128xf32> to vector<8x128xbf16>
    %c0_142 = arith.constant 0 : index
    %c0_143 = arith.constant 0 : index
    %325 = vector.load %arg2[%c0_142, %c0_143] : memref<128x512xbf16, #tpu.memory_space<vmem>>, vector<128x512xbf16>
    %cst_144 = arith.constant dense<0.000000e+00> : vector<8x512xf32>
    %326 = tpu.matmul %324, %325, %cst_144 {dimension_numbers = #tpu.dot_dimension_numbers<[1], [0], [0], [1], [0, 0, 1, 1], [], []>} : vector<8x128xbf16>, vector<128x512xbf16>, vector<8x512xf32> -> vector<8x512xf32>
    %327 = arith.addf %322, %326 : vector<8x512xf32>
    %328 = vector.extract_strided_slice %327 {offsets = [0, 0], sizes = [8, 128], strides = [1, 1]} : vector<8x512xf32> to vector<8x128xf32>
    %329 = arith.negf %328 : vector<8x128xf32>
    %330 = math.exp %329 : vector<8x128xf32>
    %cst_145 = arith.constant 1.000000e+00 : f32
    %331 = vector.broadcast %cst_145 : f32 to vector<8x128xf32>
    %332 = arith.addf %331, %330 : vector<8x128xf32>
    %333 = arith.divf %331, %332 : vector<8x128xf32>
    %334 = vector.extract_strided_slice %327 {offsets = [0, 128], sizes = [8, 128], strides = [1, 1]} : vector<8x512xf32> to vector<8x128xf32>
    %335 = arith.negf %334 : vector<8x128xf32>
    %336 = math.exp %335 : vector<8x128xf32>
    %cst_146 = arith.constant 1.000000e+00 : f32
    %337 = vector.broadcast %cst_146 : f32 to vector<8x128xf32>
    %338 = arith.addf %337, %336 : vector<8x128xf32>
    %339 = arith.divf %337, %338 : vector<8x128xf32>
    %340 = vector.extract_strided_slice %327 {offsets = [0, 256], sizes = [8, 128], strides = [1, 1]} : vector<8x512xf32> to vector<8x128xf32>
    %341 = math.tanh %340 : vector<8x128xf32>
    %342 = vector.extract_strided_slice %327 {offsets = [0, 384], sizes = [8, 128], strides = [1, 1]} : vector<8x512xf32> to vector<8x128xf32>
    %343 = arith.negf %342 : vector<8x128xf32>
    %344 = math.exp %343 : vector<8x128xf32>
    %cst_147 = arith.constant 1.000000e+00 : f32
    %345 = vector.broadcast %cst_147 : f32 to vector<8x128xf32>
    %346 = arith.addf %345, %344 : vector<8x128xf32>
    %347 = arith.divf %345, %346 : vector<8x128xf32>
    %c0_148 = arith.constant 0 : index
    %c0_149 = arith.constant 0 : index
    %348 = vector.load %arg7[%c0_148, %c0_149] : memref<8x128xf32, #tpu.memory_space<vmem>>, vector<8x128xf32>
    %349 = arith.mulf %339, %348 : vector<8x128xf32>
    %350 = arith.mulf %333, %341 : vector<8x128xf32>
    %351 = arith.addf %349, %350 : vector<8x128xf32>
    %352 = math.tanh %351 : vector<8x128xf32>
    %353 = arith.mulf %347, %352 : vector<8x128xf32>
    %c0_150 = arith.constant 0 : index
    %c0_151 = arith.constant 0 : index
    %354 = vector.load %arg7[%c0_150, %c0_151] : memref<8x128xf32, #tpu.memory_space<vmem>>, vector<8x128xf32>
    tpu.vector_store %arg7[%c0_150, %c0_151], %351 {strides = array<i32>} : memref<8x128xf32, #tpu.memory_space<vmem>>, vector<8x128xf32>,
    %c0_152 = arith.constant 0 : index
    %c0_153 = arith.constant 0 : index
    %355 = vector.load %arg6[%c0_152, %c0_153] : memref<8x128xf32, #tpu.memory_space<vmem>>, vector<8x128xf32>
    tpu.vector_store %arg6[%c0_152, %c0_153], %353 {strides = array<i32>} : memref<8x128xf32, #tpu.memory_space<vmem>>, vector<8x128xf32>,
    %356 = arith.negf %353 : vector<8x128xf32>
    %357 = math.exp %356 : vector<8x128xf32>
    %cst_154 = arith.constant 1.000000e+00 : f32
    %358 = vector.broadcast %cst_154 : f32 to vector<8x128xf32>
    %359 = arith.addf %358, %357 : vector<8x128xf32>
    %360 = arith.divf %358, %359 : vector<8x128xf32>
    %361 = arith.index_cast %320 : i32 to index
    %c0_155 = arith.constant 0 : index
    %362 = vector.load %arg4[%361, %c0_155] : memref<64x128xf32, #tpu.memory_space<vmem>>, vector<8x128xf32>
    tpu.vector_store %arg4[%361, %c0_155], %360 {strides = array<i32>} : memref<64x128xf32, #tpu.memory_space<vmem>>, vector<8x128xf32>,
    %c8_i32_156 = arith.constant 8 : i32
    return
  }
}

</mosaic_0001>

<bundles_post_ra>
// kernel: decoder_rnn_forward.1
= control target key start
LH: loop header
LB: loop body
LE: loop exit
PB: predicated region body
PF: predicated region fallthrough
CT: control target
= control target key end

     0   :  { %v4321_v1 = vmov 0   ;;  %vm116_vm0 = vcmask 261120   ;;  %v3485_v45 = vmov 0.0|0.0   ;;  %v36_v46 = vlaneseq  ;;  %s4316_s1 = inlined_call_operand.vmem [shape: bf16[32,512], index: 1, kind: input, shape index: {}]   ;;  %s4317_s0 = inlined_call_operand.vmem [shape: bf16[64,32], index: 0, kind: input, shape index: {}]   ;;  %s4318_s2 = inlined_call_operand.vmem [shape: bf16[128,512], index: 2, kind: input, shape index: {}]   ;;  %s4319_s3 = inlined_call_operand.vmem [shape: f32[1,512], index: 3, kind: input, shape index: {}]   ;;  %s4320_s4 = inlined_call_operand.vmem [shape: f32[64,128], index: 4, kind: output, shape index: {}]  }
   0x1   :  { %v3212_v0 = vld [vmem:[%s4316_s1 + $0x4] ss:$16 sps:$4 sm:$0xff]   ;;  %161 = vmatprep.mubr.bf16.mxu0 %v4321_v1  ;;  %234 = vmatprep.mubr.bf16.mxu1 %v4321_v1  ;;  %v3214_v2 = vld [vmem:[%s4316_s1 + $0xc] ss:$16 sps:$4 sm:$0xff]   ;;  %v3216_v3 = vld [vmem:[%s4316_s1] ss:$16 sps:$4 sm:$0xff]  }
   0x2   :  { %129 = vmatprep.subr.bf16.mxu0 %v3212_v0  ;;  %v3217_v4 = vld [vmem:[%s4316_s1 + $0x8] ss:$16 sps:$4 sm:$0xff]   ;;  %202 = vmatprep.subr.bf16.mxu1 %v3214_v2  ;;  %v3218_v5 = vld [vmem:[%s4316_s1 + $0x24] ss:$16 sps:$4 sm:$0xff]   ;;  %v3220_v6 = vld [vmem:[%s4316_s1 + $0x2c] ss:$16 sps:$4 sm:$0xff]  }
   0x3   :  { %130 = vmatpush1.bf16.msra.mxu0 %v3216_v3  ;;  %203 = vmatpush1.bf16.msra.mxu1 %v3217_v4  ;;  %v3222_v7 = vld [vmem:[%s4316_s1 + $0x20] ss:$16 sps:$4 sm:$0xff]   ;;  %v3223_v8 = vld [vmem:[%s4316_s1 + $0x28] ss:$16 sps:$4 sm:$0xff]   ;;  %v3548_v11 = vld [vmem:[%s4318_s2 + $0x4] ss:$16 sps:$4 sm:$0xff]  }
   0x4   :  { %131 = vmatprep.subr.bf16.mxu0 %v3218_v5  ;;  %204 = vmatprep.subr.bf16.mxu1 %v3220_v6  ;;  %v3224_v9 = vld [vmem:[%s4317_s0] sm:$0xff]   ;;  %v3553_v12 = vld [vmem:[%s4318_s2 + $0x8] ss:$16 sps:$4 sm:$0xff]   ;;  %v3558_v13 = vld [vmem:[%s4318_s2 + $0xc] ss:$16 sps:$4 sm:$0xff]   ;;  %v37_v47 = vshrl.u32 %v36_v46, 7 }
   0x5   :  { %v3543_v10 = vld [vmem:[%s4318_s2] ss:$16 sps:$4 sm:$0xff]   ;;  %v3565_v14 = vld [vmem:[%s4318_s2 + $0x24] ss:$16 sps:$4 sm:$0xff]   ;;  %v3577_v16 = vld [vmem:[%s4318_s2 + $0x2c] ss:$16 sps:$4 sm:$0xff]  }
   0x6   :  { %v3572_v15 = vld [vmem:[%s4318_s2 + $0x20] ss:$16 sps:$4 sm:$0xff]   ;;  %v3584_v17 = vld [vmem:[%s4318_s2 + $0x28] ss:$16 sps:$4 sm:$0xff]   ;;  %v3591_v18 = vld [vmem:[%s4318_s2 + $0x44] ss:$16 sps:$4 sm:$0xff]  }
   0x7   :  { %132 = vmatpush1.bf16.msra.mxu0 %v3222_v7  ;;  %205 = vmatpush1.bf16.msra.mxu1 %v3223_v8  ;;  %v3237_v19 = vld [vmem:[%s4317_s0 + $0x8] sm:$0xff]   ;;  %v3608_v21 = vld [vmem:[%s4318_s2 + $0x40] ss:$16 sps:$4 sm:$0xff]   ;;  %v3620_v23 = vld [vmem:[%s4318_s2 + $0x64] ss:$16 sps:$4 sm:$0xff]   ;;  %v46_v48 = vsub.s32 2, %v37_v47 }
   0x8   :  { %510 = vmatprep.subr.bf16.mxu0 %v3548_v11  ;;  %551 = vmatprep.subr.bf16.mxu1 %v3558_v13  ;;  %v3601_v20 = vld [vmem:[%s4318_s2 + $0x4c] ss:$16 sps:$4 sm:$0xff]   ;;  %v3613_v22 = vld [vmem:[%s4318_s2 + $0x48] ss:$16 sps:$4 sm:$0xff]   ;;  %v3632_v25 = vld [vmem:[%s4318_s2 + $0x60] ss:$16 sps:$4 sm:$0xff]  }
   0x9   :  { %v3625_v24 = vld [vmem:[%s4318_s2 + $0x6c] ss:$16 sps:$4 sm:$0xff]   ;;  %v3639_v26 = vld [vmem:[%s4318_s2 + $0x68] ss:$16 sps:$4 sm:$0xff]   ;;  %v3646_v27 = vld [vmem:[%s4318_s2 + $0x84] ss:$16 sps:$4 sm:$0xff]  }
   0xa   :  { %2907 = vmatmul.mubr.msk.bf16.vlgmr.msra.gmra.mrb[0].mxu0 %vm116_vm0, %v3224_v9  ;;  %2911 = vmatmul.mubr.msk.bf16.vlgmr.msra.gmra.mrb[0].mxu1 %vm116_vm0, %v3224_v9  ;;  %v3651_v28 = vld [vmem:[%s4318_s2 + $0x8c] ss:$16 sps:$4 sm:$0xff]   ;;  %v3250_v29 = vld [vmem:[%s4317_s0 + $0x10] sm:$0xff]   ;;  %v3666_v31 = vld [vmem:[%s4318_s2 + $0x88] ss:$16 sps:$4 sm:$0xff]   ;;  %v50_v49 = vsub.s32 3, %v37_v47 }
   0xb   :  { %511 = vmatpush1.bf16.msra.mxu0 %v3543_v10  ;;  %552 = vmatpush1.bf16.msra.mxu1 %v3553_v12  ;;  %v3661_v30 = vld [vmem:[%s4318_s2 + $0x80] ss:$16 sps:$4 sm:$0xff]   ;;  %v3673_v32 = vld [vmem:[%s4318_s2 + $0xa4] ss:$16 sps:$4 sm:$0xff]   ;;  %v3680_v33 = vld [vmem:[%s4318_s2 + $0xac] ss:$16 sps:$4 sm:$0xff]  }
   0xc   :  { %512 = vmatprep.subr.bf16.mxu0 %v3565_v14  ;;  %553 = vmatprep.subr.bf16.mxu1 %v3577_v16  ;;  %v3687_v34 = vld [vmem:[%s4318_s2 + $0xa0] ss:$16 sps:$4 sm:$0xff]   ;;  %v3692_v35 = vld [vmem:[%s4318_s2 + $0xa8] ss:$16 sps:$4 sm:$0xff]   ;;  %v3699_v36 = vld [vmem:[%s4318_s2 + $0xc4] ss:$16 sps:$4 sm:$0xff]  }
   0xd   :  { %171 = vmatprep.mubr.bf16.mxu0 %v4321_v1  ;;  %244 = vmatprep.mubr.bf16.mxu1 %v4321_v1  ;;  %v3706_v37 = vld [vmem:[%s4318_s2 + $0xcc] ss:$16 sps:$4 sm:$0xff]   ;;  %v3716_v39 = vld [vmem:[%s4318_s2 + $0xc0] ss:$16 sps:$4 sm:$0xff]   ;;  %v3721_v40 = vld [vmem:[%s4318_s2 + $0xc8] ss:$16 sps:$4 sm:$0xff]  }
   0xe   :  { %v3263_v38 = vld [vmem:[%s4317_s0 + $0x18] sm:$0xff]   ;;  %v3726_v41 = vld [vmem:[%s4318_s2 + $0xe4] ss:$16 sps:$4 sm:$0xff]   ;;  %v3740_v43 = vld [vmem:[%s4318_s2 + $0xe0] ss:$16 sps:$4 sm:$0xff]   ;;  %v38_v50 = vsub.s32 0, %v37_v47 }
   0xf   :  { %513 = vmatpush1.bf16.msra.mxu0 %v3572_v15  ;;  %554 = vmatpush1.bf16.msra.mxu1 %v3584_v17  ;;  %v3731_v42 = vld [vmem:[%s4318_s2 + $0xec] ss:$16 sps:$4 sm:$0xff]   ;;  %v3745_v44 = vld [vmem:[%s4318_s2 + $0xe8] ss:$16 sps:$4 sm:$0xff]   ;;  %v34_v51 = vld [vmem:[%s4319_s3] sm:$0xf] }
  0x10   :  { %514 = vmatprep.subr.bf16.mxu0 %v3591_v18  ;;  %555 = vmatprep.subr.bf16.mxu1 %v3601_v20  ;;  %v42_v52 = vsub.s32 1, %v37_v47  ;;  %v3796_v53 = vrot.slane %v34_v51, %v46_v48  ;;  %v3802_v56 = vrot.slane %v34_v51, %v50_v49  ;;  %v39_v57 = vrot.slane %v34_v51, %v38_v50 }
  0x12   :  { %2908 = vmatmul.mubr.msk.bf16.gmra.mrb[4].mxu0 %vm116_vm0, %v3237_v19  ;;  %2912 = vmatmul.mubr.msk.bf16.gmra.mrb[4].mxu1 %vm116_vm0, %v3237_v19  ;;  %v43_v60 = vrot.slane %v34_v51, %v42_v52 }
  0x13   :  { %515 = vmatpush1.bf16.msra.mxu0 %v3608_v21  ;;  %556 = vmatpush1.bf16.msra.mxu1 %v3613_v22 }
  0x14   :  { %516 = vmatprep.subr.bf16.mxu0 %v3620_v23  ;;  %557 = vmatprep.subr.bf16.mxu1 %v3625_v24 }
  0x15   :  { %181 = vmatprep.mubr.bf16.mxu0 %v4321_v1  ;;  %254 = vmatprep.mubr.bf16.mxu1 %v4321_v1 }
  0x17   :  { %517 = vmatpush1.bf16.msra.mxu0 %v3632_v25  ;;  %558 = vmatpush1.bf16.msra.mxu1 %v3639_v26 }
  0x18   :  { %518 = vmatprep.subr.bf16.mxu0 %v3646_v27  ;;  %559 = vmatprep.subr.bf16.mxu1 %v3651_v28 }
  0x1a   :  { %2909 = vmatmul.mubr.msk.bf16.gmra.mrb[8].mxu0 %vm116_vm0, %v3250_v29  ;;  %2913 = vmatmul.mubr.msk.bf16.gmra.mrb[8].mxu1 %vm116_vm0, %v3250_v29 }
  0x1b   :  { %519 = vmatpush1.bf16.msra.mxu0 %v3661_v30  ;;  %560 = vmatpush1.bf16.msra.mxu1 %v3666_v31 }
  0x1c   :  { %520 = vmatprep.subr.bf16.mxu0 %v3673_v32  ;;  %561 = vmatprep.subr.bf16.mxu1 %v3680_v33 }
  0x1d   :  { %191 = vmatprep.mubr.bf16.mxu0 %v4321_v1  ;;  %264 = vmatprep.mubr.bf16.mxu1 %v4321_v1 }
  0x1f   :  { %521 = vmatpush1.bf16.msra.mxu0 %v3687_v34  ;;  %562 = vmatpush1.bf16.msra.mxu1 %v3692_v35 }
  0x20   :  { %522 = vmatprep.subr.bf16.mxu0 %v3699_v36  ;;  %563 = vmatprep.subr.bf16.mxu1 %v3706_v37 }
  0x22   :  { %2910 = vmatmul.mubr.msk.bf16.gmra.mrb[12].mxu0 %vm116_vm0, %v3263_v38  ;;  %2914 = vmatmul.mubr.msk.bf16.gmra.mrb[12].mxu1 %vm116_vm0, %v3263_v38 }
  0x23   :  { %523 = vmatpush1.bf16.msra.mxu0 %v3716_v39  ;;  %564 = vmatpush1.bf16.msra.mxu1 %v3721_v40 }
  0x24   :  { %524 = vmatprep.subr.bf16.mxu0 %v3726_v41  ;;  %565 = vmatprep.subr.bf16.mxu1 %v3731_v42 }
  0x25   :  { %542 = vmatprep.mubr.bf16.mxu0 %v4321_v1  ;;  %583 = vmatprep.mubr.bf16.mxu1 %v4321_v1 }
  0x27   :  { %525 = vmatpush1.bf16.msra.mxu0 %v3740_v43  ;;  %566 = vmatpush1.bf16.msra.mxu1 %v3745_v44 }
  0x28   :  { %831 = vmatprep.subr.bf16.mxu0 %v3548_v11  ;;  %872 = vmatprep.subr.bf16.mxu1 %v3558_v13 }
  0x2a   :  { %543 = vmatmul.mubr.bf16.vlgmr.msra.gmra.mrb[16].mxu0 %v3485_v45  ;;  %584 = vmatmul.mubr.bf16.vlgmr.msra.gmra.mrb[16].mxu1 %v3485_v45 }
  0x2b   :  { %832 = vmatpush1.bf16.msra.mxu0 %v3543_v10  ;;  %873 = vmatpush1.bf16.msra.mxu1 %v3553_v12 }
  0x2c   :  { %833 = vmatprep.subr.bf16.mxu0 %v3565_v14  ;;  %874 = vmatprep.subr.bf16.mxu1 %v3577_v16 }
  0x2d   :  { %863 = vmatprep.mubr.bf16.mxu0 %v4321_v1  ;;  %904 = vmatprep.mubr.bf16.mxu1 %v4321_v1 }
  0x2f   :  { %834 = vmatpush1.bf16.msra.mxu0 %v3572_v15  ;;  %875 = vmatpush1.bf16.msra.mxu1 %v3584_v17 }
  0x30   :  { %835 = vmatprep.subr.bf16.mxu0 %v3591_v18  ;;  %876 = vmatprep.subr.bf16.mxu1 %v3601_v20 }
  0x33   :  { %836 = vmatpush1.bf16.msra.mxu0 %v3608_v21  ;;  %877 = vmatpush1.bf16.msra.mxu1 %v3613_v22 }
  0x34   :  { %837 = vmatprep.subr.bf16.mxu0 %v3620_v23  ;;  %878 = vmatprep.subr.bf16.mxu1 %v3625_v24 }
  0x37   :  { %838 = vmatpush1.bf16.msra.mxu0 %v3632_v25  ;;  %879 = vmatpush1.bf16.msra.mxu1 %v3639_v26 }
  0x38   :  { %839 = vmatprep.subr.bf16.mxu0 %v3646_v27  ;;  %880 = vmatprep.subr.bf16.mxu1 %v3651_v28 }
  0x3b   :  { %840 = vmatpush1.bf16.msra.mxu0 %v3661_v30  ;;  %881 = vmatpush1.bf16.msra.mxu1 %v3666_v31 }
  0x3c   :  { %841 = vmatprep.subr.bf16.mxu0 %v3673_v32  ;;  %882 = vmatprep.subr.bf16.mxu1 %v3680_v33 }
  0x3f   :  { %842 = vmatpush1.bf16.msra.mxu0 %v3687_v34  ;;  %883 = vmatpush1.bf16.msra.mxu1 %v3692_v35 }
  0x40   :  { %843 = vmatprep.subr.bf16.mxu0 %v3699_v36  ;;  %884 = vmatprep.subr.bf16.mxu1 %v3706_v37 }
  0x43   :  { %844 = vmatpush1.bf16.msra.mxu0 %v3716_v39  ;;  %885 = vmatpush1.bf16.msra.mxu1 %v3721_v40 }
  0x44   :  { %845 = vmatprep.subr.bf16.mxu0 %v3726_v41  ;;  %886 = vmatprep.subr.bf16.mxu1 %v3731_v42 }
  0x47   :  { %846 = vmatpush1.bf16.msra.mxu0 %v3740_v43  ;;  %887 = vmatpush1.bf16.msra.mxu1 %v3745_v44 }
  0x48   :  { %1153 = vmatprep.subr.bf16.mxu0 %v3548_v11  ;;  %1194 = vmatprep.subr.bf16.mxu1 %v3558_v13 }
  0xdd   :  { %v3798_v54 = vpop.f32.mrb[0].mxu0  ;;  %v3800_v55 = vpop.f32.mrb[0].mxu1 }
  0xde   :  { %v165_v58 = vpop.f32.mrb[1].mxu0  ;;  %v238_v59 = vpop.f32.mrb[1].mxu1 }
  0xdf   :  { %v167_v61 = vpop.f32.mrb[2].mxu0  ;;  %v240_v62 = vpop.f32.mrb[2].mxu1 }
  0xe0   :  { %v3804_v63 = vadd.f32 %v167_v61, %v39_v57  ;;  %v169_v0 = vpop.f32.mrb[3].mxu0  ;;  %v3807_v2 = vadd.f32 %v240_v62, %v3796_v53  ;;  %v242_v3 = vpop.f32.mrb[3].mxu1 }
  0xe1   :  { %v3809_v4 = vadd.f32 %v169_v0, %v43_v60  ;;  %v3812_v5 = vadd.f32 %v242_v3, %v3802_v56 }
  0xe5   :  { %v173_v6 = vpop.f32.mrb[4].mxu0  ;;  %v246_v7 = vpop.f32.mrb[4].mxu1 }
  0xe6   :  { %v3814_v8 = vadd.f32 %v173_v6, %v39_v57  ;;  %v175_v9 = vpop.f32.mrb[5].mxu0  ;;  %v3817_v19 = vadd.f32 %v246_v7, %v3796_v53  ;;  %v248_v29 = vpop.f32.mrb[5].mxu1 }
  0xe7   :  { %v3819_v38 = vadd.f32 %v175_v9, %v43_v60  ;;  %v177_v45 = vpop.f32.mrb[6].mxu0  ;;  %v3822_v46 = vadd.f32 %v248_v29, %v3802_v56  ;;  %v250_v47 = vpop.f32.mrb[6].mxu1 }
  0xe8   :  { %v3824_v48 = vadd.f32 %v177_v45, %v39_v57  ;;  %v179_v49 = vpop.f32.mrb[7].mxu0  ;;  %v3827_v50 = vadd.f32 %v250_v47, %v3796_v53  ;;  %v252_v51 = vpop.f32.mrb[7].mxu1 }
  0xe9   :  { %4323 = vst [vmem:[#allocation5_spill] sm:$0xff] %v3822_v46  ;;  %v3829_v52 = vadd.f32 %v179_v49, %v43_v60  ;;  %v3832_v61 = vadd.f32 %v252_v51, %v3802_v56 }
  0xea   :  { %4324 = vst [vmem:[#allocation6_spill] sm:$0xff] %v3824_v48  ;;  %4325 = vst [vmem:[#allocation7_spill] sm:$0xff] %v3827_v50 }
  0xeb   :  { %4326 = vst [vmem:[#allocation8_spill] sm:$0xff] %v3829_v52  ;;  %4327 = vst [vmem:[#allocation9_spill] sm:$0xff] %v3832_v61 }
  0xed   :  { %v183_v62 = vpop.f32.mrb[8].mxu0  ;;  %v256_v0 = vpop.f32.mrb[8].mxu1 }
  0xee   :  { %v3834_v3 = vadd.f32 %v183_v62, %v39_v57  ;;  %v185_v6 = vpop.f32.mrb[9].mxu0  ;;  %v3837_v7 = vadd.f32 %v256_v0, %v3796_v53  ;;  %v258_v9 = vpop.f32.mrb[9].mxu1 }
  0xef   :  { %v3839_v29 = vadd.f32 %v185_v6, %v43_v60  ;;  %v187_v45 = vpop.f32.mrb[10].mxu0  ;;  %v3842_v47 = vadd.f32 %v258_v9, %v3802_v56  ;;  %v260_v49 = vpop.f32.mrb[10].mxu1 }
  0xf0   :  { %4328 = vst [vmem:[#allocation10_spill] sm:$0xff] %v3834_v3  ;;  %4329 = vst [vmem:[#allocation11_spill] sm:$0xff] %v3837_v7  ;;  %v3844_v1 = vadd.f32 %v187_v45, %v39_v57  ;;  %v189_v51 = vpop.f32.mrb[11].mxu0  ;;  %v3847_v61 = vadd.f32 %v260_v49, %v3796_v53  ;;  %v262_v62 = vpop.f32.mrb[11].mxu1 }
  0xf1   :  { %4330 = vst [vmem:[#allocation12_spill] sm:$0xff] %v3839_v29  ;;  %4331 = vst [vmem:[#allocation13_spill] sm:$0xff] %v3842_v47  ;;  %v3849_v3 = vadd.f32 %v189_v51, %v43_v60  ;;  %v3852_v0 = vadd.f32 %v262_v62, %v3802_v56 }
  0xf2   :  { %4332 = vst [vmem:[#allocation14_spill] sm:$0xff] %v3844_v1  ;;  %4333 = vst [vmem:[#allocation15_spill] sm:$0xff] %v3847_v61 }
  0xf3   :  { %4334 = vst [vmem:[#allocation16_spill] sm:$0xff] %v3849_v3  ;;  %4335 = vst [vmem:[#allocation17_spill] sm:$0xff] %v3852_v0 }
  0xf5   :  { %v193_v7 = vpop.f32.mrb[12].mxu0  ;;  %v266_v6 = vpop.f32.mrb[12].mxu1 }
  0xf6   :  { %v3854_v29 = vadd.f32 %v193_v7, %v39_v57  ;;  %v195_v52 = vpop.f32.mrb[13].mxu0  ;;  %v3857_v9 = vadd.f32 %v266_v6, %v3796_v53  ;;  %v268_v45 = vpop.f32.mrb[13].mxu1 }
  0xf7   :  { %v3859_v1 = vadd.f32 %v195_v52, %v43_v60  ;;  %v197_v47 = vpop.f32.mrb[14].mxu0  ;;  %v3862_v49 = vadd.f32 %v268_v45, %v3802_v56  ;;  %v270_v51 = vpop.f32.mrb[14].mxu1  ;;  %v164_v52 = vadd.f32 %v3798_v54, %v39_v57  ;;  %v166_v45 = vadd.f32 %v165_v58, %v43_v60 }
  0xf8   :  { %4336 = vst [vmem:[#allocation18_spill] sm:$0xff] %v3854_v29  ;;  %4337 = vst [vmem:[#allocation19_spill] sm:$0xff] %v3857_v9  ;;  %v3864_v3 = vadd.f32 %v197_v47, %v39_v57  ;;  %v199_v62 = vpop.f32.mrb[15].mxu0  ;;  %v3867_v0 = vadd.f32 %v270_v51, %v3796_v53  ;;  %v272_v7 = vpop.f32.mrb[15].mxu1 }
  0xf9   :  { %4338 = vst [vmem:[#allocation20_spill] sm:$0xff] %v3859_v1  ;;  %4339 = vst [vmem:[#allocation21_spill] sm:$0xff] %v3862_v49  ;;  %v3869_v29 = vadd.f32 %v199_v62, %v43_v60  ;;  %v3872_v6 = vadd.f32 %v272_v7, %v3802_v56  ;;  %v237_v1 = vadd.f32 %v3800_v55, %v3796_v53 }
  0xfa   :  { %4340 = vst [vmem:[#allocation22_spill] sm:$0xff] %v3864_v3  ;;  %4341 = vst [vmem:[#allocation23_spill] sm:$0xff] %v3867_v0  ;;  %v239_v49 = vadd.f32 %v238_v59, %v3802_v56 }
  0xfb   :  { %4342 = vst [vmem:[#allocation24_spill] sm:$0xff] %v3869_v29  ;;  %4343 = vst [vmem:[#allocation25_spill] sm:$0xff] %v3872_v6 }
  0xfd   :  { %v544_v47 = vpop.f32.mrb[16].mxu0  ;;  %v585_v3 = vpop.f32.mrb[16].mxu1 }
  0xfe   :  { %v592_v9 = vadd.f32 %v544_v47, %v164_v52  ;;  %v594_v61 = vadd.f32 %v585_v3, %v237_v1  ;;  %v546_v51 = vpop.f32.mrb[17].mxu0  ;;  %v587_v0 = vpop.f32.mrb[17].mxu1  ;;  %v4344_v52 = vmov 0  }
  0xff   :  { %v593_v50 = vadd.f32 %v546_v51, %v166_v45  ;;  %v595_v62 = vadd.f32 %v587_v0, %v239_v49  ;;  %v548_v29 = vpop.f32.mrb[18].mxu0  ;;  %v589_v48 = vpop.f32.mrb[18].mxu1 }
 0x100   :  { %v2947_v7 = vmul.f32 -1.442695, %v592_v9  ;;  %v549_v6 = vpop.f32.mrb[19].mxu0  ;;  %v590_v46 = vpop.f32.mrb[19].mxu1 }
 0x101   :  { %v2948_v54 = vmul.f32 -1.442695, %v593_v50  ;;  %v2949_v53 = vmul.f32 -1.442695, %v595_v62 }
 0x102   :  { %3324 = vpow2.f32 %v2947_v7 }
 0x103   :  { %3326 = vpow2.f32 %v2948_v54 }
 0x104   :  { %3328 = vpow2.f32 %v2949_v53 }
 0x105   :  { %3330 = vtanh.f32 %v594_v61 }
 0x10c   :  { %v3325_v55 = vpop.eup %3324 }
 0x10d   :  { %v3327_v57 = vpop.eup %3326  ;;  %v599_v56 = vadd.f32 1.0, %v3325_v55 }
 0x10e   :  { %v605_v58 = vadd.f32 1.0, %v3327_v57  ;;  %v3329_v1 = vpop.eup %3328 }
 0x10f   :  { %3332 = vrcp.f32 %v599_v56  ;;  %v3331_v59 = vpop.eup %3330  ;;  %v612_v29 = vadd.f32 1.0, %v3329_v1 }
 0x110   :  { %3334 = vrcp.f32 %v605_v58 }
 0x111   :  { %3336 = vrcp.f32 %v612_v29 }
 0x119   :  { %v3333_v60 = vpop.eup %3332 }
 0x11a   :  { %v3335_v3 = vpop.eup %3334  ;;  %v617_v48 = vmul.f32 %v3333_v60, %v3331_v59 }
 0x11b   :  { %v616_v0 = vmul.f32 0.0, %v3335_v3  ;;  %v3337_v50 = vpop.eup %3336 }
 0x11d   :  { %v3878_v46 = vadd.f32 %v617_v48, %v616_v0 }
 0x11f   :  { %3338 = vtanh.f32 %v3878_v46 }
 0x129   :  { %v3339_v9 = vpop.eup %3338 }
 0x12a   :  { %v620_v49 = vmul.f32 %v3339_v9, %v3337_v50 }
 0x12c   :  { %v2950_v6 = vmul.f32 -1.442695, %v620_v49  ;;  %v638_v61 = vpack.c.bf16 %v620_v49, %v620_v49 }
 0x12e   :  { %3340 = vpow2.f32 %v2950_v6  ;;  %864 = vmatmul.mubr.bf16.vlgmr.msra.gmra.mrb[20].mxu0 %v638_v61  ;;  %905 = vmatmul.mubr.bf16.vlgmr.msra.gmra.mrb[20].mxu1 %v638_v61 }
 0x12f   :  { %1154 = vmatpush1.bf16.msra.mxu0 %v3543_v10  ;;  %1195 = vmatpush1.bf16.msra.mxu1 %v3553_v12 }
 0x130   :  { %1155 = vmatprep.subr.bf16.mxu0 %v3565_v14  ;;  %1196 = vmatprep.subr.bf16.mxu1 %v3577_v16 }
 0x131   :  { %1185 = vmatprep.mubr.bf16.mxu0 %v4344_v52  ;;  %1226 = vmatprep.mubr.bf16.mxu1 %v4344_v52 }
 0x133   :  { %1156 = vmatpush1.bf16.msra.mxu0 %v3572_v15  ;;  %1197 = vmatpush1.bf16.msra.mxu1 %v3584_v17 }
 0x134   :  { %1157 = vmatprep.subr.bf16.mxu0 %v3591_v18  ;;  %1198 = vmatprep.subr.bf16.mxu1 %v3601_v20 }
 0x137   :  { %1158 = vmatpush1.bf16.msra.mxu0 %v3608_v21  ;;  %1199 = vmatpush1.bf16.msra.mxu1 %v3613_v22 }
 0x138   :  { %v3341_v45 = vpop.eup %3340  ;;  %1159 = vmatprep.subr.bf16.mxu0 %v3620_v23  ;;  %1200 = vmatprep.subr.bf16.mxu1 %v3625_v24 }
 0x139   :  { %v626_v47 = vadd.f32 1.0, %v3341_v45 }
 0x13b   :  { %3342 = vrcp.f32 %v626_v47  ;;  %1160 = vmatpush1.bf16.msra.mxu0 %v3632_v25  ;;  %1201 = vmatpush1.bf16.msra.mxu1 %v3639_v26 }
 0x13c   :  { %1161 = vmatprep.subr.bf16.mxu0 %v3646_v27  ;;  %1202 = vmatprep.subr.bf16.mxu1 %v3651_v28 }
 0x13f   :  { %1162 = vmatpush1.bf16.msra.mxu0 %v3661_v30  ;;  %1203 = vmatpush1.bf16.msra.mxu1 %v3666_v31 }
 0x140   :  { %1163 = vmatprep.subr.bf16.mxu0 %v3673_v32  ;;  %1204 = vmatprep.subr.bf16.mxu1 %v3680_v33 }
 0x143   :  { %1164 = vmatpush1.bf16.msra.mxu0 %v3687_v34  ;;  %1205 = vmatpush1.bf16.msra.mxu1 %v3692_v35 }
 0x144   :  { %1165 = vmatprep.subr.bf16.mxu0 %v3699_v36  ;;  %1206 = vmatprep.subr.bf16.mxu1 %v3706_v37 }
 0x145   :  { %v3343_v51 = vpop.eup %3342 }
 0x146   :  { %629 = vst [vmem:[%s4320_s4] sm:$0xff] %v3343_v51 }
 0x147   :  { %1166 = vmatpush1.bf16.msra.mxu0 %v3716_v39  ;;  %1207 = vmatpush1.bf16.msra.mxu1 %v3721_v40 }
 0x148   :  { %1167 = vmatprep.subr.bf16.mxu0 %v3726_v41  ;;  %1208 = vmatprep.subr.bf16.mxu1 %v3731_v42 }
 0x14b   :  { %1168 = vmatpush1.bf16.msra.mxu0 %v3740_v43  ;;  %1209 = vmatpush1.bf16.msra.mxu1 %v3745_v44 }
 0x14c   :  { %1475 = vmatprep.subr.bf16.mxu0 %v3548_v11  ;;  %1516 = vmatprep.subr.bf16.mxu1 %v3558_v13 }
 0x201   :  { %v865_v62 = vpop.f32.mrb[20].mxu0  ;;  %v906_v7 = vpop.f32.mrb[20].mxu1 }
 0x202   :  { %v913_v54 = vadd.f32 %v865_v62, %v3804_v63  ;;  %v915_v53 = vadd.f32 %v906_v7, %v3807_v2  ;;  %v867_v55 = vpop.f32.mrb[21].mxu0  ;;  %v908_v57 = vpop.f32.mrb[21].mxu1 }
 0x203   :  { %v914_v56 = vadd.f32 %v867_v55, %v3809_v4  ;;  %v916_v58 = vadd.f32 %v908_v57, %v3812_v5  ;;  %v869_v1 = vpop.f32.mrb[22].mxu0  ;;  %v910_v59 = vpop.f32.mrb[22].mxu1 }
 0x204   :  { %v2983_v60 = vmul.f32 -1.442695, %v913_v54  ;;  %v870_v3 = vpop.f32.mrb[23].mxu0  ;;  %v911_v48 = vpop.f32.mrb[23].mxu1  ;;  %v3977_v1 = vld [vmem:[%s4318_s2 + $0x4] ss:$16 sps:$4 sm:$0xff]  }
 0x205   :  { %v2984_v11 = vmul.f32 -1.442695, %v914_v56  ;;  %v2985_v13 = vmul.f32 -1.442695, %v916_v58  ;;  %v3982_v59 = vld [vmem:[%s4318_s2 + $0xc] ss:$16 sps:$4 sm:$0xff]  }
 0x206   :  { %3344 = vpow2.f32 %v2983_v60  ;;  %v3987_v60 = vld [vmem:[%s4318_s2] ss:$16 sps:$4 sm:$0xff]   ;;  %v3992_v3 = vld [vmem:[%s4318_s2 + $0x8] ss:$16 sps:$4 sm:$0xff]   ;;  %v4001_v48 = vld [vmem:[%s4318_s2 + $0x24] ss:$16 sps:$4 sm:$0xff]  }
 0x207   :  { %3346 = vpow2.f32 %v2984_v11  ;;  %v4006_v11 = vld [vmem:[%s4318_s2 + $0x2c] ss:$16 sps:$4 sm:$0xff]  }
 0x208   :  { %3348 = vpow2.f32 %v2985_v13  ;;  %v4011_v13 = vld [vmem:[%s4318_s2 + $0x20] ss:$16 sps:$4 sm:$0xff]  }
 0x209   :  { %3350 = vtanh.f32 %v915_v53 }
 0x210   :  { %v3345_v29 = vpop.eup %3344 }
 0x211   :  { %v3347_v0 = vpop.eup %3346  ;;  %v920_v63 = vadd.f32 1.0, %v3345_v29  ;;  %v4016_v29 = vld [vmem:[%s4318_s2 + $0x28] ss:$16 sps:$4 sm:$0xff]  }
 0x212   :  { %v926_v2 = vadd.f32 1.0, %v3347_v0  ;;  %v3349_v4 = vpop.eup %3348  ;;  %v4025_v0 = vld [vmem:[%s4318_s2 + $0x44] ss:$16 sps:$4 sm:$0xff]  }
 0x213   :  { %3352 = vrcp.f32 %v920_v63  ;;  %v3351_v50 = vpop.eup %3350  ;;  %v933_v6 = vadd.f32 1.0, %v3349_v4  ;;  %v4030_v63 = vld [vmem:[%s4318_s2 + $0x4c] ss:$16 sps:$4 sm:$0xff]   ;;  %v4040_v4 = vld [vmem:[%s4318_s2 + $0x48] ss:$16 sps:$4 sm:$0xff]  }
 0x214   :  { %3354 = vrcp.f32 %v926_v2  ;;  %v4035_v2 = vld [vmem:[%s4318_s2 + $0x40] ss:$16 sps:$4 sm:$0xff]  }
 0x215   :  { %3356 = vrcp.f32 %v933_v6  ;;  %v4073_v6 = vld [vmem:[%s4318_s2 + $0x84] ss:$16 sps:$4 sm:$0xff]  }
 0x21d   :  { %v3353_v5 = vpop.eup %3352 }
 0x21e   :  { %v3355_v9 = vpop.eup %3354  ;;  %v938_v49 = vmul.f32 %v3353_v5, %v3351_v50  ;;  %v4049_v50 = vld [vmem:[%s4318_s2 + $0x64] ss:$16 sps:$4 sm:$0xff]   ;;  %v4054_v5 = vld [vmem:[%s4318_s2 + $0x6c] ss:$16 sps:$4 sm:$0xff]  }
 0x21f   :  { %v937_v61 = vmul.f32 %v3355_v9, %v3878_v46  ;;  %v3357_v47 = vpop.eup %3356  ;;  %v4059_v9 = vld [vmem:[%s4318_s2 + $0x60] ss:$16 sps:$4 sm:$0xff]  }
 0x221   :  { %v3923_v45 = vadd.f32 %v938_v49, %v937_v61  ;;  %v4064_v49 = vld [vmem:[%s4318_s2 + $0x68] ss:$16 sps:$4 sm:$0xff]   ;;  %v4078_v61 = vld [vmem:[%s4318_s2 + $0x8c] ss:$16 sps:$4 sm:$0xff]  }
 0x223   :  { %3358 = vtanh.f32 %v3923_v45 }
 0x22d   :  { %v3359_v51 = vpop.eup %3358 }
 0x22e   :  { %v941_v62 = vmul.f32 %v3359_v51, %v3357_v47  ;;  %v4088_v47 = vld [vmem:[%s4318_s2 + $0x88] ss:$16 sps:$4 sm:$0xff]   ;;  %v4095_v51 = vld [vmem:[%s4318_s2 + $0xa4] ss:$16 sps:$4 sm:$0xff]  }
 0x230   :  { %v2986_v7 = vmul.f32 -1.442695, %v941_v62  ;;  %v960_v54 = vpack.c.bf16 %v941_v62, %v941_v62  ;;  %v4102_v62 = vld [vmem:[%s4318_s2 + $0xa0] ss:$16 sps:$4 sm:$0xff]  }
 0x232   :  { %3360 = vpow2.f32 %v2986_v7  ;;  %1186 = vmatmul.mubr.bf16.vlgmr.msra.gmra.mrb[24].mxu0 %v960_v54  ;;  %1227 = vmatmul.mubr.bf16.vlgmr.msra.gmra.mrb[24].mxu1 %v960_v54  ;;  %v4107_v7 = vld [vmem:[%s4318_s2 + $0xa8] ss:$16 sps:$4 sm:$0xff]   ;;  %v4112_v54 = vld [vmem:[%s4318_s2 + $0xac] ss:$16 sps:$4 sm:$0xff]  }
 0x233   :  { %1476 = vmatpush1.bf16.msra.mxu0 %v3543_v10  ;;  %1517 = vmatpush1.bf16.msra.mxu1 %v3553_v12 }
 0x234   :  { %1477 = vmatprep.subr.bf16.mxu0 %v3565_v14  ;;  %1518 = vmatprep.subr.bf16.mxu1 %v3577_v16 }
 0x235   :  { %1507 = vmatprep.mubr.bf16.mxu0 %v4344_v52  ;;  %1548 = vmatprep.mubr.bf16.mxu1 %v4344_v52 }
 0x237   :  { %1478 = vmatpush1.bf16.msra.mxu0 %v3572_v15  ;;  %1519 = vmatpush1.bf16.msra.mxu1 %v3584_v17 }
 0x238   :  { %1479 = vmatprep.subr.bf16.mxu0 %v3591_v18  ;;  %1520 = vmatprep.subr.bf16.mxu1 %v3601_v20 }
 0x23b   :  { %1480 = vmatpush1.bf16.msra.mxu0 %v3608_v21  ;;  %1521 = vmatpush1.bf16.msra.mxu1 %v3613_v22 }
 0x23c   :  { %v3361_v10 = vpop.eup %3360  ;;  %1481 = vmatprep.subr.bf16.mxu0 %v3620_v23  ;;  %1522 = vmatprep.subr.bf16.mxu1 %v3625_v24  ;;  %v4345_v23 = vld [vmem:[#allocation5_spill] sm:$0xff] }
 0x23d   :  { %v947_v12 = vadd.f32 1.0, %v3361_v10  ;;  %v4118_v10 = vld [vmem:[%s4318_s2 + $0xc4] ss:$16 sps:$4 sm:$0xff]  }
 0x23f   :  { %3362 = vrcp.f32 %v947_v12  ;;  %1482 = vmatpush1.bf16.msra.mxu0 %v3632_v25  ;;  %1523 = vmatpush1.bf16.msra.mxu1 %v3639_v26  ;;  %v4123_v12 = vld [vmem:[%s4318_s2 + $0xcc] ss:$16 sps:$4 sm:$0xff]  }
 0x240   :  { %1483 = vmatprep.subr.bf16.mxu0 %v3646_v27  ;;  %1524 = vmatprep.subr.bf16.mxu1 %v3651_v28 }
 0x243   :  { %1484 = vmatpush1.bf16.msra.mxu0 %v3661_v30  ;;  %1525 = vmatpush1.bf16.msra.mxu1 %v3666_v31 }
 0x244   :  { %1485 = vmatprep.subr.bf16.mxu0 %v3673_v32  ;;  %1526 = vmatprep.subr.bf16.mxu1 %v3680_v33 }
 0x247   :  { %1486 = vmatpush1.bf16.msra.mxu0 %v3687_v34  ;;  %1527 = vmatpush1.bf16.msra.mxu1 %v3692_v35 }
 0x248   :  { %1487 = vmatprep.subr.bf16.mxu0 %v3699_v36  ;;  %1528 = vmatprep.subr.bf16.mxu1 %v3706_v37 }
 0x249   :  { %v3363_v14 = vpop.eup %3362 }
 0x24a   :  { %2987 = vst [vmem:[%s4320_s4 + $0x8] sm:$0xff] %v3363_v14  ;;  %v4131_v14 = vld [vmem:[%s4318_s2 + $0xc0] ss:$16 sps:$4 sm:$0xff]  }
 0x24b   :  { %1488 = vmatpush1.bf16.msra.mxu0 %v3716_v39  ;;  %1529 = vmatpush1.bf16.msra.mxu1 %v3721_v40 }
 0x24c   :  { %1489 = vmatprep.subr.bf16.mxu0 %v3726_v41  ;;  %1530 = vmatprep.subr.bf16.mxu1 %v3731_v42 }
 0x24f   :  { %1490 = vmatpush1.bf16.msra.mxu0 %v3740_v43  ;;  %1531 = vmatpush1.bf16.msra.mxu1 %v3745_v44 }
 0x250   :  { %1797 = vmatprep.subr.bf16.mxu0 %v3977_v1  ;;  %1838 = vmatprep.subr.bf16.mxu1 %v3982_v59 }
 0x305   :  { %v1187_v15 = vpop.f32.mrb[24].mxu0  ;;  %v1228_v16 = vpop.f32.mrb[24].mxu1 }
 0x306   :  { %v1235_v17 = vadd.f32 %v1187_v15, %v3814_v8  ;;  %v1237_v18 = vadd.f32 %v1228_v16, %v3817_v19  ;;  %v1189_v20 = vpop.f32.mrb[25].mxu0  ;;  %v1230_v21 = vpop.f32.mrb[25].mxu1  ;;  %v4136_v15 = vld [vmem:[%s4318_s2 + $0xc8] ss:$16 sps:$4 sm:$0xff]   ;;  %v4143_v16 = vld [vmem:[%s4318_s2 + $0xe4] ss:$16 sps:$4 sm:$0xff]  }
 0x307   :  { %v1236_v22 = vadd.f32 %v1189_v20, %v3819_v38  ;;  %v1238_v24 = vadd.f32 %v1230_v21, %v4345_v23  ;;  %v1191_v25 = vpop.f32.mrb[26].mxu0  ;;  %v1232_v26 = vpop.f32.mrb[26].mxu1  ;;  %v4160_v20 = vld [vmem:[%s4318_s2 + $0xe8] ss:$16 sps:$4 sm:$0xff]  }
 0x308   :  { %v3020_v27 = vmul.f32 -1.442695, %v1235_v17  ;;  %v1192_v28 = vpop.f32.mrb[27].mxu0  ;;  %v1233_v30 = vpop.f32.mrb[27].mxu1  ;;  %v4148_v17 = vld [vmem:[%s4318_s2 + $0xec] ss:$16 sps:$4 sm:$0xff]  }
 0x309   :  { %v3021_v31 = vmul.f32 -1.442695, %v1236_v22  ;;  %v3022_v32 = vmul.f32 -1.442695, %v1238_v24  ;;  %v4346_v23 = vld [vmem:[#allocation6_spill] sm:$0xff]  ;;  %v4347_v25 = vld [vmem:[#allocation7_spill] sm:$0xff] }
 0x30a   :  { %3364 = vpow2.f32 %v3020_v27  ;;  %v4348_v30 = vld [vmem:[#allocation8_spill] sm:$0xff] }
 0x30b   :  { %3366 = vpow2.f32 %v3021_v31 }
 0x30c   :  { %3368 = vpow2.f32 %v3022_v32  ;;  %v4349_v32 = vld [vmem:[#allocation9_spill] sm:$0xff] }
 0x30d   :  { %3370 = vtanh.f32 %v1237_v18  ;;  %v4155_v18 = vld [vmem:[%s4318_s2 + $0xe0] ss:$16 sps:$4 sm:$0xff]  }
 0x314   :  { %v3365_v33 = vpop.eup %3364 }
 0x315   :  { %v3367_v34 = vpop.eup %3366  ;;  %v1242_v35 = vadd.f32 1.0, %v3365_v33 }
 0x316   :  { %v1248_v36 = vadd.f32 1.0, %v3367_v34  ;;  %v3369_v37 = vpop.eup %3368 }
 0x317   :  { %3372 = vrcp.f32 %v1242_v35  ;;  %v3371_v39 = vpop.eup %3370  ;;  %v1255_v43 = vadd.f32 1.0, %v3369_v37 }
 0x318   :  { %3374 = vrcp.f32 %v1248_v36 }
 0x319   :  { %3376 = vrcp.f32 %v1255_v43 }
 0x321   :  { %v3373_v40 = vpop.eup %3372 }
 0x322   :  { %v3375_v41 = vpop.eup %3374  ;;  %v1260_v42 = vmul.f32 %v3373_v40, %v3371_v39 }
 0x323   :  { %v1259_v44 = vmul.f32 %v3375_v41, %v3923_v45  ;;  %v3377_v19 = vpop.eup %3376  ;;  %v4083_v45 = vld [vmem:[%s4318_s2 + $0x80] ss:$16 sps:$4 sm:$0xff]  }
 0x325   :  { %v3966_v8 = vadd.f32 %v1260_v42, %v1259_v44 }
 0x327   :  { %3378 = vtanh.f32 %v3966_v8 }
 0x331   :  { %v3379_v38 = vpop.eup %3378 }
 0x332   :  { %v1263_v46 = vmul.f32 %v3379_v38, %v3377_v19 }
 0x334   :  { %v3023_v53 = vmul.f32 -1.442695, %v1263_v46  ;;  %v1282_v55 = vpack.c.bf16 %v1263_v46, %v1263_v46 }
 0x336   :  { %3380 = vpow2.f32 %v3023_v53  ;;  %1508 = vmatmul.mubr.bf16.vlgmr.msra.gmra.mrb[28].mxu0 %v1282_v55  ;;  %1549 = vmatmul.mubr.bf16.vlgmr.msra.gmra.mrb[28].mxu1 %v1282_v55 }
 0x337   :  { %1829 = vmatprep.mubr.bf16.mxu0 %v4344_v52  ;;  %1870 = vmatprep.mubr.bf16.mxu1 %v4344_v52 }
 0x338   :  { %1798 = vmatpush1.bf16.msra.mxu0 %v3987_v60  ;;  %1839 = vmatpush1.bf16.msra.mxu1 %v3992_v3 }
 0x339   :  { %1799 = vmatprep.subr.bf16.mxu0 %v4001_v48  ;;  %1840 = vmatprep.subr.bf16.mxu1 %v4006_v11 }
 0x33c   :  { %1800 = vmatpush1.bf16.msra.mxu0 %v4011_v13  ;;  %1841 = vmatpush1.bf16.msra.mxu1 %v4016_v29 }
 0x33d   :  { %1801 = vmatprep.subr.bf16.mxu0 %v4025_v0  ;;  %1842 = vmatprep.subr.bf16.mxu1 %v4030_v63 }
 0x340   :  { %v3381_v57 = vpop.eup %3380  ;;  %1802 = vmatpush1.bf16.msra.mxu0 %v4035_v2  ;;  %1843 = vmatpush1.bf16.msra.mxu1 %v4040_v4 }
 0x341   :  { %v1269_v56 = vadd.f32 1.0, %v3381_v57  ;;  %1803 = vmatprep.subr.bf16.mxu0 %v4049_v50  ;;  %1844 = vmatprep.subr.bf16.mxu1 %v4054_v5 }
 0x343   :  { %3382 = vrcp.f32 %v1269_v56 }
 0x344   :  { %1804 = vmatpush1.bf16.msra.mxu0 %v4059_v9  ;;  %1845 = vmatpush1.bf16.msra.mxu1 %v4064_v49 }
 0x345   :  { %1805 = vmatprep.subr.bf16.mxu0 %v4073_v6  ;;  %1846 = vmatprep.subr.bf16.mxu1 %v4078_v61 }
 0x348   :  { %1806 = vmatpush1.bf16.msra.mxu0 %v4083_v45  ;;  %1847 = vmatpush1.bf16.msra.mxu1 %v4088_v47 }
 0x349   :  { %1807 = vmatprep.subr.bf16.mxu0 %v4095_v51  ;;  %1848 = vmatprep.subr.bf16.mxu1 %v4112_v54 }
 0x34c   :  { %1808 = vmatpush1.bf16.msra.mxu0 %v4102_v62  ;;  %1849 = vmatpush1.bf16.msra.mxu1 %v4107_v7 }
 0x34d   :  { %v3383_v58 = vpop.eup %3382  ;;  %1809 = vmatprep.subr.bf16.mxu0 %v4118_v10  ;;  %1850 = vmatprep.subr.bf16.mxu1 %v4123_v12 }
 0x34e   :  { %3024 = vst [vmem:[%s4320_s4 + $0x10] sm:$0xff] %v3383_v58 }
 0x350   :  { %1810 = vmatpush1.bf16.msra.mxu0 %v4131_v14  ;;  %1851 = vmatpush1.bf16.msra.mxu1 %v4136_v15 }
 0x351   :  { %1811 = vmatprep.subr.bf16.mxu0 %v4143_v16  ;;  %1852 = vmatprep.subr.bf16.mxu1 %v4148_v17 }
 0x354   :  { %1812 = vmatpush1.bf16.msra.mxu0 %v4155_v18  ;;  %1853 = vmatpush1.bf16.msra.mxu1 %v4160_v20 }
 0x355   :  { %2119 = vmatprep.subr.bf16.mxu0 %v3977_v1  ;;  %2160 = vmatprep.subr.bf16.mxu1 %v3982_v59 }
 0x409   :  { %v1509_v21 = vpop.f32.mrb[28].mxu0  ;;  %v1550_v22 = vpop.f32.mrb[28].mxu1 }
 0x40a   :  { %v1557_v24 = vadd.f32 %v1509_v21, %v4346_v23  ;;  %v1559_v26 = vadd.f32 %v1550_v22, %v4347_v25  ;;  %v1511_v27 = vpop.f32.mrb[29].mxu0  ;;  %v1552_v28 = vpop.f32.mrb[29].mxu1 }
 0x40b   :  { %v1558_v31 = vadd.f32 %v1511_v27, %v4348_v30  ;;  %v1560_v33 = vadd.f32 %v1552_v28, %v4349_v32  ;;  %v1513_v34 = vpop.f32.mrb[30].mxu0  ;;  %v1554_v35 = vpop.f32.mrb[30].mxu1  ;;  %v4350_v32 = vld [vmem:[#allocation10_spill] sm:$0xff] }
 0x40c   :  { %v3057_v36 = vmul.f32 -1.442695, %v1557_v24  ;;  %v1514_v37 = vpop.f32.mrb[31].mxu0  ;;  %v1555_v39 = vpop.f32.mrb[31].mxu1  ;;  %v4351_v34 = vld [vmem:[#allocation11_spill] sm:$0xff] }
 0x40d   :  { %v3058_v40 = vmul.f32 -1.442695, %v1558_v31  ;;  %v3059_v41 = vmul.f32 -1.442695, %v1560_v33  ;;  %v4352_v39 = vld [vmem:[#allocation12_spill] sm:$0xff] }
 0x40e   :  { %3384 = vpow2.f32 %v3057_v36 }
 0x40f   :  { %3386 = vpow2.f32 %v3058_v40 }
 0x410   :  { %3388 = vpow2.f32 %v3059_v41  ;;  %v4353_v41 = vld [vmem:[#allocation13_spill] sm:$0xff] }
 0x411   :  { %3390 = vtanh.f32 %v1559_v26 }
 0x418   :  { %v3385_v42 = vpop.eup %3384 }
 0x419   :  { %v3387_v43 = vpop.eup %3386  ;;  %v1564_v44 = vadd.f32 1.0, %v3385_v42 }
 0x41a   :  { %v1570_v19 = vadd.f32 1.0, %v3387_v43  ;;  %v3389_v38 = vpop.eup %3388 }
 0x41b   :  { %3392 = vrcp.f32 %v1564_v44  ;;  %v3391_v46 = vpop.eup %3390  ;;  %v1577_v56 = vadd.f32 1.0, %v3389_v38 }
 0x41c   :  { %3394 = vrcp.f32 %v1570_v19 }
 0x41d   :  { %3396 = vrcp.f32 %v1577_v56 }
 0x425   :  { %v3393_v53 = vpop.eup %3392 }
 0x426   :  { %v3395_v55 = vpop.eup %3394  ;;  %v1582_v57 = vmul.f32 %v3393_v53, %v3391_v46 }
 0x427   :  { %v1581_v58 = vmul.f32 %v3395_v55, %v3966_v8  ;;  %v3397_v22 = vpop.eup %3396 }
 0x429   :  { %v4173_v21 = vadd.f32 %v1582_v57, %v1581_v58 }
 0x42b   :  { %3398 = vtanh.f32 %v4173_v21 }
 0x435   :  { %v3399_v23 = vpop.eup %3398 }
 0x436   :  { %v1585_v24 = vmul.f32 %v3399_v23, %v3397_v22 }
 0x438   :  { %v3060_v25 = vmul.f32 -1.442695, %v1585_v24  ;;  %v1604_v26 = vpack.c.bf16 %v1585_v24, %v1585_v24 }
 0x43a   :  { %3400 = vpow2.f32 %v3060_v25  ;;  %1830 = vmatmul.mubr.bf16.vlgmr.msra.gmra.mrb[32].mxu0 %v1604_v26  ;;  %1871 = vmatmul.mubr.bf16.vlgmr.msra.gmra.mrb[32].mxu1 %v1604_v26 }
 0x43b   :  { %2120 = vmatpush1.bf16.msra.mxu0 %v3987_v60  ;;  %2161 = vmatpush1.bf16.msra.mxu1 %v3992_v3 }
 0x43c   :  { %2121 = vmatprep.subr.bf16.mxu0 %v4001_v48  ;;  %2162 = vmatprep.subr.bf16.mxu1 %v4006_v11 }
 0x43d   :  { %2151 = vmatprep.mubr.bf16.mxu0 %v4344_v52  ;;  %2192 = vmatprep.mubr.bf16.mxu1 %v4344_v52 }
 0x43f   :  { %2122 = vmatpush1.bf16.msra.mxu0 %v4011_v13  ;;  %2163 = vmatpush1.bf16.msra.mxu1 %v4016_v29 }
 0x440   :  { %2123 = vmatprep.subr.bf16.mxu0 %v4025_v0  ;;  %2164 = vmatprep.subr.bf16.mxu1 %v4030_v63 }
 0x443   :  { %2124 = vmatpush1.bf16.msra.mxu0 %v4035_v2  ;;  %2165 = vmatpush1.bf16.msra.mxu1 %v4040_v4 }
 0x444   :  { %v3401_v8 = vpop.eup %3400  ;;  %2125 = vmatprep.subr.bf16.mxu0 %v4049_v50  ;;  %2166 = vmatprep.subr.bf16.mxu1 %v4054_v5 }
 0x445   :  { %v1591_v27 = vadd.f32 1.0, %v3401_v8 }
 0x447   :  { %3402 = vrcp.f32 %v1591_v27  ;;  %2126 = vmatpush1.bf16.msra.mxu0 %v4059_v9  ;;  %2167 = vmatpush1.bf16.msra.mxu1 %v4064_v49 }
 0x448   :  { %2127 = vmatprep.subr.bf16.mxu0 %v4073_v6  ;;  %2168 = vmatprep.subr.bf16.mxu1 %v4078_v61 }
 0x44b   :  { %2128 = vmatpush1.bf16.msra.mxu0 %v4083_v45  ;;  %2169 = vmatpush1.bf16.msra.mxu1 %v4088_v47 }
 0x44c   :  { %2129 = vmatprep.subr.bf16.mxu0 %v4095_v51  ;;  %2170 = vmatprep.subr.bf16.mxu1 %v4112_v54 }
 0x44f   :  { %2130 = vmatpush1.bf16.msra.mxu0 %v4102_v62  ;;  %2171 = vmatpush1.bf16.msra.mxu1 %v4107_v7 }
 0x450   :  { %2131 = vmatprep.subr.bf16.mxu0 %v4118_v10  ;;  %2172 = vmatprep.subr.bf16.mxu1 %v4123_v12 }
 0x451   :  { %v3403_v28 = vpop.eup %3402 }
 0x452   :  { %3061 = vst [vmem:[%s4320_s4 + $0x18] sm:$0xff] %v3403_v28 }
 0x453   :  { %2132 = vmatpush1.bf16.msra.mxu0 %v4131_v14  ;;  %2173 = vmatpush1.bf16.msra.mxu1 %v4136_v15 }
 0x454   :  { %2133 = vmatprep.subr.bf16.mxu0 %v4143_v16  ;;  %2174 = vmatprep.subr.bf16.mxu1 %v4148_v17 }
 0x457   :  { %2134 = vmatpush1.bf16.msra.mxu0 %v4155_v18  ;;  %2175 = vmatpush1.bf16.msra.mxu1 %v4160_v20 }
 0x458   :  { %2441 = vmatprep.subr.bf16.mxu0 %v3977_v1  ;;  %2482 = vmatprep.subr.bf16.mxu1 %v3982_v59 }
 0x50d   :  { %v1831_v30 = vpop.f32.mrb[32].mxu0  ;;  %v1872_v31 = vpop.f32.mrb[32].mxu1 }
 0x50e   :  { %v1879_v33 = vadd.f32 %v1831_v30, %v4350_v32  ;;  %v1881_v35 = vadd.f32 %v1872_v31, %v4351_v34  ;;  %v1833_v36 = vpop.f32.mrb[33].mxu0  ;;  %v1874_v37 = vpop.f32.mrb[33].mxu1 }
 0x50f   :  { %v1880_v40 = vadd.f32 %v1833_v36, %v4352_v39  ;;  %v1882_v42 = vadd.f32 %v1874_v37, %v4353_v41  ;;  %v1835_v43 = vpop.f32.mrb[34].mxu0  ;;  %v1876_v44 = vpop.f32.mrb[34].mxu1  ;;  %v4354_v41 = vld [vmem:[#allocation14_spill] sm:$0xff] }
 0x510   :  { %v3094_v19 = vmul.f32 -1.442695, %v1879_v33  ;;  %v1836_v38 = vpop.f32.mrb[35].mxu0  ;;  %v1877_v46 = vpop.f32.mrb[35].mxu1  ;;  %v4355_v43 = vld [vmem:[#allocation15_spill] sm:$0xff] }
 0x511   :  { %v3095_v53 = vmul.f32 -1.442695, %v1880_v40  ;;  %v3096_v55 = vmul.f32 -1.442695, %v1882_v42  ;;  %v4356_v46 = vld [vmem:[#allocation16_spill] sm:$0xff] }
 0x512   :  { %3404 = vpow2.f32 %v3094_v19 }
 0x513   :  { %3406 = vpow2.f32 %v3095_v53 }
 0x514   :  { %3408 = vpow2.f32 %v3096_v55  ;;  %v4357_v55 = vld [vmem:[#allocation17_spill] sm:$0xff] }
 0x515   :  { %3410 = vtanh.f32 %v1881_v35 }
 0x51c   :  { %v3405_v57 = vpop.eup %3404 }
 0x51d   :  { %v3407_v56 = vpop.eup %3406  ;;  %v1886_v58 = vadd.f32 1.0, %v3405_v57 }
 0x51e   :  { %v1892_v22 = vadd.f32 1.0, %v3407_v56  ;;  %v3409_v23 = vpop.eup %3408 }
 0x51f   :  { %3412 = vrcp.f32 %v1886_v58  ;;  %v3411_v24 = vpop.eup %3410  ;;  %v1899_v27 = vadd.f32 1.0, %v3409_v23 }
 0x520   :  { %3414 = vrcp.f32 %v1892_v22 }
 0x521   :  { %3416 = vrcp.f32 %v1899_v27 }
 0x529   :  { %v3413_v25 = vpop.eup %3412 }
 0x52a   :  { %v3415_v26 = vpop.eup %3414  ;;  %v1904_v8 = vmul.f32 %v3413_v25, %v3411_v24 }
 0x52b   :  { %v1903_v28 = vmul.f32 %v3415_v26, %v4173_v21  ;;  %v3417_v31 = vpop.eup %3416 }
 0x52d   :  { %v4218_v30 = vadd.f32 %v1904_v8, %v1903_v28 }
 0x52f   :  { %3418 = vtanh.f32 %v4218_v30 }
 0x539   :  { %v3419_v32 = vpop.eup %3418 }
 0x53a   :  { %v1907_v33 = vmul.f32 %v3419_v32, %v3417_v31 }
 0x53c   :  { %v3097_v34 = vmul.f32 -1.442695, %v1907_v33  ;;  %v1926_v35 = vpack.c.bf16 %v1907_v33, %v1907_v33 }
 0x53e   :  { %3420 = vpow2.f32 %v3097_v34  ;;  %2152 = vmatmul.mubr.bf16.vlgmr.msra.gmra.mrb[36].mxu0 %v1926_v35  ;;  %2193 = vmatmul.mubr.bf16.vlgmr.msra.gmra.mrb[36].mxu1 %v1926_v35 }
 0x53f   :  { %2442 = vmatpush1.bf16.msra.mxu0 %v3987_v60  ;;  %2483 = vmatpush1.bf16.msra.mxu1 %v3992_v3 }
 0x540   :  { %2443 = vmatprep.subr.bf16.mxu0 %v4001_v48  ;;  %2484 = vmatprep.subr.bf16.mxu1 %v4006_v11 }
 0x541   :  { %2473 = vmatprep.mubr.bf16.mxu0 %v4344_v52  ;;  %2514 = vmatprep.mubr.bf16.mxu1 %v4344_v52 }
 0x543   :  { %2444 = vmatpush1.bf16.msra.mxu0 %v4011_v13  ;;  %2485 = vmatpush1.bf16.msra.mxu1 %v4016_v29 }
 0x544   :  { %2445 = vmatprep.subr.bf16.mxu0 %v4025_v0  ;;  %2486 = vmatprep.subr.bf16.mxu1 %v4030_v63 }
 0x547   :  { %2446 = vmatpush1.bf16.msra.mxu0 %v4035_v2  ;;  %2487 = vmatpush1.bf16.msra.mxu1 %v4040_v4 }
 0x548   :  { %v3421_v21 = vpop.eup %3420  ;;  %2447 = vmatprep.subr.bf16.mxu0 %v4049_v50  ;;  %2488 = vmatprep.subr.bf16.mxu1 %v4054_v5 }
 0x549   :  { %v1913_v36 = vadd.f32 1.0, %v3421_v21 }
 0x54b   :  { %3422 = vrcp.f32 %v1913_v36  ;;  %2448 = vmatpush1.bf16.msra.mxu0 %v4059_v9  ;;  %2489 = vmatpush1.bf16.msra.mxu1 %v4064_v49 }
 0x54c   :  { %2449 = vmatprep.subr.bf16.mxu0 %v4073_v6  ;;  %2490 = vmatprep.subr.bf16.mxu1 %v4078_v61 }
 0x54f   :  { %2450 = vmatpush1.bf16.msra.mxu0 %v4083_v45  ;;  %2491 = vmatpush1.bf16.msra.mxu1 %v4088_v47 }
 0x550   :  { %2451 = vmatprep.subr.bf16.mxu0 %v4095_v51  ;;  %2492 = vmatprep.subr.bf16.mxu1 %v4112_v54 }
 0x553   :  { %2452 = vmatpush1.bf16.msra.mxu0 %v4102_v62  ;;  %2493 = vmatpush1.bf16.msra.mxu1 %v4107_v7 }
 0x554   :  { %2453 = vmatprep.subr.bf16.mxu0 %v4118_v10  ;;  %2494 = vmatprep.subr.bf16.mxu1 %v4123_v12 }
 0x555   :  { %v3423_v37 = vpop.eup %3422 }
 0x556   :  { %3098 = vst [vmem:[%s4320_s4 + $0x20] sm:$0xff] %v3423_v37 }
 0x557   :  { %2454 = vmatpush1.bf16.msra.mxu0 %v4131_v14  ;;  %2495 = vmatpush1.bf16.msra.mxu1 %v4136_v15 }
 0x558   :  { %2455 = vmatprep.subr.bf16.mxu0 %v4143_v16  ;;  %2496 = vmatprep.subr.bf16.mxu1 %v4148_v17 }
 0x55b   :  { %2456 = vmatpush1.bf16.msra.mxu0 %v4155_v18  ;;  %2497 = vmatpush1.bf16.msra.mxu1 %v4160_v20 }
 0x55c   :  { %2763 = vmatprep.subr.bf16.mxu0 %v3977_v1  ;;  %2804 = vmatprep.subr.bf16.mxu1 %v3982_v59 }
 0x611   :  { %v2153_v39 = vpop.f32.mrb[36].mxu0  ;;  %v2194_v40 = vpop.f32.mrb[36].mxu1 }
 0x612   :  { %v2201_v42 = vadd.f32 %v2153_v39, %v4354_v41  ;;  %v2203_v44 = vadd.f32 %v2194_v40, %v4355_v43  ;;  %v2155_v19 = vpop.f32.mrb[37].mxu0  ;;  %v2196_v38 = vpop.f32.mrb[37].mxu1 }
 0x613   :  { %v2202_v53 = vadd.f32 %v2155_v19, %v4356_v46  ;;  %v2204_v57 = vadd.f32 %v2196_v38, %v4357_v55  ;;  %v2157_v56 = vpop.f32.mrb[38].mxu0  ;;  %v2198_v58 = vpop.f32.mrb[38].mxu1 }
 0x614   :  { %v3131_v22 = vmul.f32 -1.442695, %v2201_v42  ;;  %v2158_v23 = vpop.f32.mrb[39].mxu0  ;;  %v2199_v24 = vpop.f32.mrb[39].mxu1 }
 0x615   :  { %v3132_v1 = vmul.f32 -1.442695, %v2202_v53  ;;  %v3133_v59 = vmul.f32 -1.442695, %v2204_v57  ;;  %v4362_v24 = vld [vmem:[#allocation22_spill] sm:$0xff] }
 0x616   :  { %3424 = vpow2.f32 %v3131_v22 }
 0x617   :  { %3426 = vpow2.f32 %v3132_v1 }
 0x618   :  { %3428 = vpow2.f32 %v3133_v59  ;;  %v4363_v59 = vld [vmem:[#allocation23_spill] sm:$0xff] }
 0x619   :  { %3430 = vtanh.f32 %v2203_v44 }
 0x620   :  { %v3425_v25 = vpop.eup %3424 }
 0x621   :  { %v3427_v26 = vpop.eup %3426  ;;  %v2208_v8 = vadd.f32 1.0, %v3425_v25 }
 0x622   :  { %v2214_v27 = vadd.f32 1.0, %v3427_v26  ;;  %v3429_v28 = vpop.eup %3428 }
 0x623   :  { %3432 = vrcp.f32 %v2208_v8  ;;  %v3431_v31 = vpop.eup %3430  ;;  %v2221_v35 = vadd.f32 1.0, %v3429_v28 }
 0x624   :  { %3434 = vrcp.f32 %v2214_v27  ;;  %v4364_v27 = vld [vmem:[#allocation24_spill] sm:$0xff] }
 0x625   :  { %3436 = vrcp.f32 %v2221_v35 }
 0x62d   :  { %v3433_v32 = vpop.eup %3432 }
 0x62e   :  { %v3435_v33 = vpop.eup %3434  ;;  %v2226_v34 = vmul.f32 %v3433_v32, %v3431_v31  ;;  %v4365_v31 = vld [vmem:[#allocation25_spill] sm:$0xff] }
 0x62f   :  { %v2225_v21 = vmul.f32 %v3435_v33, %v4218_v30  ;;  %v3437_v37 = vpop.eup %3436 }
 0x631   :  { %v4263_v36 = vadd.f32 %v2226_v34, %v2225_v21 }
 0x633   :  { %3438 = vtanh.f32 %v4263_v36 }
 0x63d   :  { %v3439_v39 = vpop.eup %3438 }
 0x63e   :  { %v2229_v40 = vmul.f32 %v3439_v39, %v3437_v37 }
 0x640   :  { %v3134_v41 = vmul.f32 -1.442695, %v2229_v40  ;;  %v2248_v42 = vpack.c.bf16 %v2229_v40, %v2229_v40 }
 0x642   :  { %3440 = vpow2.f32 %v3134_v41  ;;  %2474 = vmatmul.mubr.bf16.vlgmr.msra.gmra.mrb[40].mxu0 %v2248_v42  ;;  %2515 = vmatmul.mubr.bf16.vlgmr.msra.gmra.mrb[40].mxu1 %v2248_v42 }
 0x643   :  { %2764 = vmatpush1.bf16.msra.mxu0 %v3987_v60  ;;  %2805 = vmatpush1.bf16.msra.mxu1 %v3992_v3 }
 0x644   :  { %2765 = vmatprep.subr.bf16.mxu0 %v4001_v48  ;;  %2806 = vmatprep.subr.bf16.mxu1 %v4006_v11 }
 0x645   :  { %2795 = vmatprep.mubr.bf16.mxu0 %v4344_v52  ;;  %2836 = vmatprep.mubr.bf16.mxu1 %v4344_v52 }
 0x647   :  { %2766 = vmatpush1.bf16.msra.mxu0 %v4011_v13  ;;  %2807 = vmatpush1.bf16.msra.mxu1 %v4016_v29  ;;  %v4358_v13 = vld [vmem:[#allocation18_spill] sm:$0xff] }
 0x648   :  { %2767 = vmatprep.subr.bf16.mxu0 %v4025_v0  ;;  %2808 = vmatprep.subr.bf16.mxu1 %v4030_v63  ;;  %v4359_v0 = vld [vmem:[#allocation19_spill] sm:$0xff] }
 0x64b   :  { %2768 = vmatpush1.bf16.msra.mxu0 %v4035_v2  ;;  %2809 = vmatpush1.bf16.msra.mxu1 %v4040_v4 }
 0x64c   :  { %v3441_v60 = vpop.eup %3440  ;;  %2769 = vmatprep.subr.bf16.mxu0 %v4049_v50  ;;  %2810 = vmatprep.subr.bf16.mxu1 %v4054_v5  ;;  %v4360_v50 = vld [vmem:[#allocation20_spill] sm:$0xff] }
 0x64d   :  { %v2235_v3 = vadd.f32 1.0, %v3441_v60 }
 0x64f   :  { %3442 = vrcp.f32 %v2235_v3  ;;  %2770 = vmatpush1.bf16.msra.mxu0 %v4059_v9  ;;  %2811 = vmatpush1.bf16.msra.mxu1 %v4064_v49  ;;  %v4361_v9 = vld [vmem:[#allocation21_spill] sm:$0xff] }
 0x650   :  { %2771 = vmatprep.subr.bf16.mxu0 %v4073_v6  ;;  %2812 = vmatprep.subr.bf16.mxu1 %v4078_v61 }
 0x653   :  { %2772 = vmatpush1.bf16.msra.mxu0 %v4083_v45  ;;  %2813 = vmatpush1.bf16.msra.mxu1 %v4088_v47 }
 0x654   :  { %2773 = vmatprep.subr.bf16.mxu0 %v4095_v51  ;;  %2814 = vmatprep.subr.bf16.mxu1 %v4112_v54 }
 0x657   :  { %2774 = vmatpush1.bf16.msra.mxu0 %v4102_v62  ;;  %2815 = vmatpush1.bf16.msra.mxu1 %v4107_v7 }
 0x658   :  { %2775 = vmatprep.subr.bf16.mxu0 %v4118_v10  ;;  %2816 = vmatprep.subr.bf16.mxu1 %v4123_v12 }
 0x659   :  { %v3443_v52 = vpop.eup %3442 }
 0x65a   :  { %3135 = vst [vmem:[%s4320_s4 + $0x28] sm:$0xff] %v3443_v52 }
 0x65b   :  { %2776 = vmatpush1.bf16.msra.mxu0 %v4131_v14  ;;  %2817 = vmatpush1.bf16.msra.mxu1 %v4136_v15 }
 0x65c   :  { %2777 = vmatprep.subr.bf16.mxu0 %v4143_v16  ;;  %2818 = vmatprep.subr.bf16.mxu1 %v4148_v17 }
 0x65f   :  { %2778 = vmatpush1.bf16.msra.mxu0 %v4155_v18  ;;  %2819 = vmatpush1.bf16.msra.mxu1 %v4160_v20 }
 0x715   :  { %v2475_v48 = vpop.f32.mrb[40].mxu0  ;;  %v2516_v11 = vpop.f32.mrb[40].mxu1 }
 0x716   :  { %v2523_v29 = vadd.f32 %v2475_v48, %v4358_v13  ;;  %v2525_v63 = vadd.f32 %v2516_v11, %v4359_v0  ;;  %v2477_v2 = vpop.f32.mrb[41].mxu0  ;;  %v2518_v4 = vpop.f32.mrb[41].mxu1 }
 0x717   :  { %v2524_v5 = vadd.f32 %v2477_v2, %v4360_v50  ;;  %v2526_v49 = vadd.f32 %v2518_v4, %v4361_v9  ;;  %v2479_v6 = vpop.f32.mrb[42].mxu0  ;;  %v2520_v61 = vpop.f32.mrb[42].mxu1 }
 0x718   :  { %v3168_v45 = vmul.f32 -1.442695, %v2523_v29  ;;  %v2480_v47 = vpop.f32.mrb[43].mxu0  ;;  %v2521_v51 = vpop.f32.mrb[43].mxu1 }
 0x719   :  { %v3169_v62 = vmul.f32 -1.442695, %v2524_v5  ;;  %v3170_v7 = vmul.f32 -1.442695, %v2526_v49 }
 0x71a   :  { %3444 = vpow2.f32 %v3168_v45 }
 0x71b   :  { %3446 = vpow2.f32 %v3169_v62 }
 0x71c   :  { %3448 = vpow2.f32 %v3170_v7 }
 0x71d   :  { %3450 = vtanh.f32 %v2525_v63 }
 0x724   :  { %v3445_v54 = vpop.eup %3444 }
 0x725   :  { %v3447_v10 = vpop.eup %3446  ;;  %v2530_v12 = vadd.f32 1.0, %v3445_v54 }
 0x726   :  { %v2536_v14 = vadd.f32 1.0, %v3447_v10  ;;  %v3449_v15 = vpop.eup %3448 }
 0x727   :  { %3452 = vrcp.f32 %v2530_v12  ;;  %v3451_v16 = vpop.eup %3450  ;;  %v2543_v30 = vadd.f32 1.0, %v3449_v15 }
 0x728   :  { %3454 = vrcp.f32 %v2536_v14 }
 0x729   :  { %3456 = vrcp.f32 %v2543_v30 }
 0x731   :  { %v3453_v17 = vpop.eup %3452 }
 0x732   :  { %v3455_v18 = vpop.eup %3454  ;;  %v2548_v20 = vmul.f32 %v3453_v17, %v3451_v16 }
 0x733   :  { %v2547_v43 = vmul.f32 %v3455_v18, %v4263_v36  ;;  %v3457_v19 = vpop.eup %3456 }
 0x735   :  { %v2549_v44 = vadd.f32 %v2548_v20, %v2547_v43 }
 0x737   :  { %3458 = vtanh.f32 %v2549_v44 }
 0x741   :  { %v3459_v38 = vpop.eup %3458 }
 0x742   :  { %v2551_v46 = vmul.f32 %v3459_v38, %v3457_v19 }
 0x744   :  { %v3171_v53 = vmul.f32 -1.442695, %v2551_v46  ;;  %v2570_v55 = vpack.c.bf16 %v2551_v46, %v2551_v46 }
 0x746   :  { %3460 = vpow2.f32 %v3171_v53  ;;  %2796 = vmatmul.mubr.bf16.vlgmr.msra.gmra.mrb[44].mxu0 %v2570_v55  ;;  %2837 = vmatmul.mubr.bf16.vlgmr.msra.gmra.mrb[44].mxu1 %v2570_v55 }
 0x750   :  { %v3461_v57 = vpop.eup %3460 }
 0x751   :  { %v2557_v56 = vadd.f32 1.0, %v3461_v57 }
 0x753   :  { %3462 = vrcp.f32 %v2557_v56 }
 0x75d   :  { %v3463_v58 = vpop.eup %3462 }
 0x75e   :  { %3172 = vst [vmem:[%s4320_s4 + $0x30] sm:$0xff] %v3463_v58 }
 0x819   :  { %v2797_v22 = vpop.f32.mrb[44].mxu0  ;;  %v2838_v23 = vpop.f32.mrb[44].mxu1 }
 0x81a   :  { %v2845_v1 = vadd.f32 %v2797_v22, %v4362_v24  ;;  %v2847_v25 = vadd.f32 %v2838_v23, %v4363_v59  ;;  %v2799_v26 = vpop.f32.mrb[45].mxu0  ;;  %v2840_v8 = vpop.f32.mrb[45].mxu1 }
 0x81b   :  { %v2846_v28 = vadd.f32 %v2799_v26, %v4364_v27  ;;  %v2848_v32 = vadd.f32 %v2840_v8, %v4365_v31  ;;  %v2801_v33 = vpop.f32.mrb[46].mxu0  ;;  %v2842_v34 = vpop.f32.mrb[46].mxu1 }
 0x81c   :  { %v3205_v35 = vmul.f32 -1.442695, %v2845_v1  ;;  %v2802_v21 = vpop.f32.mrb[47].mxu0  ;;  %v2843_v36 = vpop.f32.mrb[47].mxu1 }
 0x81d   :  { %v3206_v37 = vmul.f32 -1.442695, %v2846_v28  ;;  %v3207_v39 = vmul.f32 -1.442695, %v2848_v32 }
 0x81e   :  { %3464 = vpow2.f32 %v3205_v35 }
 0x81f   :  { %3466 = vpow2.f32 %v3206_v37 }
 0x820   :  { %3468 = vpow2.f32 %v3207_v39 }
 0x821   :  { %3470 = vtanh.f32 %v2847_v25 }
 0x828   :  { %v3465_v40 = vpop.eup %3464 }
 0x829   :  { %v3467_v41 = vpop.eup %3466  ;;  %v2852_v42 = vadd.f32 1.0, %v3465_v40 }
 0x82a   :  { %v2858_v60 = vadd.f32 1.0, %v3467_v41  ;;  %v3469_v3 = vpop.eup %3468 }
 0x82b   :  { %3472 = vrcp.f32 %v2852_v42  ;;  %v3471_v52 = vpop.eup %3470  ;;  %v2865_v29 = vadd.f32 1.0, %v3469_v3 }
 0x82c   :  { %3474 = vrcp.f32 %v2858_v60 }
 0x82d   :  { %3476 = vrcp.f32 %v2865_v29 }
 0x835   :  { %v3473_v48 = vpop.eup %3472 }
 0x836   :  { %v3475_v11 = vpop.eup %3474  ;;  %v2870_v13 = vmul.f32 %v3473_v48, %v3471_v52 }
 0x837   :  { %v2869_v0 = vmul.f32 %v3475_v11, %v2549_v44  ;;  %v3477_v2 = vpop.eup %3476 }
 0x839   :  { %v2871_v63 = vadd.f32 %v2870_v13, %v2869_v0 }
 0x83b   :  { %3478 = vtanh.f32 %v2871_v63 }
 0x845   :  { %v3479_v4 = vpop.eup %3478 }
 0x846   :  { %v2873_v50 = vmul.f32 %v3479_v4, %v3477_v2 }
 0x848   :  { %v3208_v5 = vmul.f32 -1.442695, %v2873_v50 }
 0x84a   :  { %3480 = vpow2.f32 %v3208_v5 }
 0x854   :  { %v3481_v9 = vpop.eup %3480 }
 0x855   :  { %v2879_v49 = vadd.f32 1.0, %v3481_v9 }
 0x857   :  { %3482 = vrcp.f32 %v2879_v49 }
 0x861   :  { %v3483_v6 = vpop.eup %3482 }
 0x862   :  { %3209 = vst [vmem:[%s4320_s4 + $0x38] sm:$0xff] %v3483_v6 }

</bundles_post_ra>
